<compile_context>
chip_gen: v7x
topology: tpu7x:2x2x1
jax: 0.10.0
libtpu: 0.0.40
codegen_flags: <defaults>
</compile_context>

<pallas_src>
import functools

import jax
import jax.numpy as jnp
from jax.experimental import pallas as pl
from jax.experimental.pallas import tpu as pltpu

EPS = 1e-5                       # nn.GroupNorm default eps
_INV_SQRT2 = 0.7071067811865476
# Abramowitz & Stegun 7.1.26 erf polynomial with the GELU 1/sqrt(2) argument
# folded into the rational denominator and the leading 0.5 folded into the
# numerator coefficients (saves ~7 VALU ops/element vs. the naive form).
_P_ERF = 0.3275911 * _INV_SQRT2
_A1 = 0.5 * 0.254829592
_A2 = 0.5 * -0.284496736
_A3 = 0.5 * 1.421413741
_A4 = 0.5 * -1.453152027
_A5 = 0.5 * 1.061405429


def _gelu_exact(x):
    # gelu(x) = 0.5*x*(1 + erf(x/sqrt(2)))
    #         = relu(x) - |x| * [0.5*P(t)] * exp(-0.5*x^2),
    #           t = 1/(1 + 0.3275911*|x|/sqrt(2))
    # Sign select eliminated; reciprocal + exp ride the otherwise-idle EUP slot.
    # TODO(synk): switch to lax.erf if/when the erf primitive lowers under Mosaic.
    ax = jnp.abs(x)
    t = pl.reciprocal(1.0 + _P_ERF * ax, approx=True)
    poly = ((((_A5 * t + _A4) * t + _A3) * t + _A2) * t + _A1) * t
    return jnp.maximum(x, 0.0) - ax * poly * jnp.exp(-0.5 * x * x)


def conv_gn_gelu_kernel(c_ref, h_ref, w_ref, g_ref, b_ref, o_ref,
                        sum_ref, ssq_ref, *, t_out, kc):
    """One (batch-block, phase, time-tile) grid step.

    c_ref:   (BB, R, SC)        stride-wide input chunks (bf16) for this tile
    h_ref:   (BB, 1, KC-1, SC)  halo chunks just past the tile
    w_ref:   (KC, SC, Cout)     conv weights regrouped per chunk
    g_ref/b_ref: (1, 1, Cout)   GroupNorm affine
    o_ref:   (BB, R, Cout)      output tile (written only in phase 1)
    sum_ref/ssq_ref: (BB, 1, Cout) f32 GN accumulators (persist across steps)
    """
    phase = pl.program_id(1)
    t = pl.program_id(2)
    bb, r, sc = c_ref.shape

    @pl.when(jnp.logical_and(phase == 0, t == 0))
    def _init():
        sum_ref[...] = jnp.zeros_like(sum_ref)
        ssq_ref[...] = jnp.zeros_like(ssq_ref)

    # In-kernel im2col: output row r needs chunks r .. r+KC-1.  Append the halo
    # at an aligned sublane offset and take the (cheap, unpacked f32) shifted
    # slices on the matmul RESULTS rather than on packed bf16 inputs.
    c_ext = jnp.concatenate(
        [c_ref[...], h_ref[...].reshape(bb, kc - 1, sc)], axis=1)   # (BB,R+KC-1,SC)

    y = None
    for j in range(kc):
        z = jnp.einsum('brk,kc->brc', c_ext, w_ref[j],
                       preferred_element_type=jnp.float32)          # (BB,R+KC-1,C)
        zj = z[:, j:j + r, :]
        y = zj if y is None else y + zj                              # (BB, R, C) f32

    @pl.when(phase == 0)
    def _accumulate():
        # Mask rows past the true T_out (they may alias real tail samples) so
        # the GroupNorm statistics stay exact; divide by the true T_out later.
        row = t * r + jax.lax.broadcasted_iota(jnp.int32, (bb, r, 1), 1)
        ym = y * (row < t_out).astype(jnp.float32)
        sum_ref[...] += jnp.sum(ym, axis=1, keepdims=True)
        ssq_ref[...] += jnp.sum(ym * ym, axis=1, keepdims=True)

    @pl.when(phase == 1)
    def _normalize():
        inv_n = jnp.float32(1.0 / t_out)
        mean = sum_ref[...] * inv_n                                  # (BB,1,C)
        # NOTE: single-pass E[y^2]-E[y]^2 in f32 (see correctness notes).
        var = jnp.maximum(ssq_ref[...] * inv_n - mean * mean, 0.0)
        scale = g_ref[...] * jax.lax.rsqrt(var + EPS)                # fused affine
        shift = b_ref[...] - mean * scale
        o_ref[...] = _gelu_exact(y * scale + shift).astype(o_ref.dtype)


@functools.partial(
    jax.jit,
    static_argnames=("stride", "row_tile", "batch_block", "out_dtype",
                     "channels_last", "use_bf16"))
def conv_feature_extraction(x, w, gamma, beta, *, stride=5, row_tile=None,
                            batch_block=1, out_dtype=None, channels_last=False,
                            use_bf16=True):
    """First ConvFeatureExtractionModel block (the only one the reference
    forward() executes): Conv1d(k, stride, no bias) -> Dropout(0) ->
    GroupNorm(C, C) -> exact GELU.

    x: (B, C_in, T) NCW; w: (C_out, C_in, K); gamma/beta: (C_out,).
    Returns (B, C_out, T_out), or (B, T_out, C_out) if channels_last=True.
    """
    B, Cin, T = x.shape
    Cout, _, K = w.shape
    assert T >= K, "reference forward returns None when x.shape[-1] < kernel"
    assert K > stride, "in-kernel im2col assumes >1 chunk per output row"
    T_out = (T - K) // stride + 1

    KC = -(-K // stride)          # chunks touched per output row (2 for k=10,s=5)
    SC = stride * Cin             # chunk width (= 290 for the first block)

    # Output-row tile: multiple of 16 (bf16 sublane packing), multiple of 256
    # when large (MXU M on v6e/v7x).  ~1K rows keeps the per-step working set
    # well inside v7x's scoped VMEM while amortizing the ~0.35 us/step overhead
    # on v5e/v6e (pass a larger row_tile + vmem headroom there if desired).
    if row_tile is None:
        row_tile = min(1024, -(-T_out // 16) * 16)
    R = max(16, -(-row_tile // 16) * 16)
    n_t = -(-T_out // R)
    T_rows = n_t * R
    n5 = T_rows + KC - 1          # number of stride-wide chunks the kernel touches

    # Channel-last bf16 chunk view of x (the only wrapper-side data movement;
    # the im2col itself happens inside the kernel).
    mx = jnp.bfloat16 if use_bf16 else jnp.float32
    x_cl = jnp.transpose(x, (0, 2, 1)).astype(mx)        # (B, T, Cin)
    need = n5 * stride
    if need > T:
        x_cl = jnp.pad(x_cl, ((0, 0), (0, need - T), (0, 0)))
    elif need < T:
        x_cl = x_cl[:, :need, :]
    x5 = x_cl.reshape(B, n5, SC)                         # (B, n5, SC)

    # Per-tile halo: the KC-1 chunks just past each tile (tiny: ~SC elems/tile).
    offs = (jnp.arange(n_t) + 1) * R
    offs = offs[:, None] + jnp.arange(KC - 1)[None, :]   # (n_t, KC-1)
    halo = x5[:, offs, :]                                # (B, n_t, KC-1, SC)

    # Conv weights regrouped per chunk: wj[j, m*Cin + ci, co] = w[co, ci, j*s+m].
    w_p = jnp.pad(w, ((0, 0), (0, 0), (0, KC * stride - K)))
    w_j = (w_p.reshape(Cout, Cin, KC, stride)
              .transpose(2, 3, 1, 0)
              .reshape(KC, SC, Cout)
              .astype(mx))

    g3 = gamma.reshape(1, 1, Cout).astype(jnp.float32)
    b3 = beta.reshape(1, 1, Cout).astype(jnp.float32)

    BB = batch_block
    assert B % BB == 0
    od = jnp.dtype(x.dtype if out_dtype is None else out_dtype)
    in_bytes = x5.size * x5.dtype.itemsize
    out_bytes = B * T_rows * Cout * od.itemsize

    out_btc = pl.pallas_call(
        functools.partial(conv_gn_gelu_kernel, t_out=T_out, kc=KC),
        out_shape=jax.ShapeDtypeStruct((B, T_rows, Cout), od),
        # grid: batch blocks x (phase 0 = GN stats, phase 1 = normalize) x time.
        grid=(B // BB, 2, n_t),
        in_specs=[
            pl.BlockSpec((BB, R, SC), lambda b, p, t: (b, t, 0)),
            pl.BlockSpec((BB, 1, KC - 1, SC), lambda b, p, t: (b, t, 0, 0)),
            pl.BlockSpec((KC, SC, Cout), lambda b, p, t: (0, 0, 0)),
            pl.BlockSpec((1, 1, Cout), lambda b, p, t: (0, 0, 0)),
            pl.BlockSpec((1, 1, Cout), lambda b, p, t: (0, 0, 0)),
        ],
        # Phase 0 parks the output window on tile 0 (never flushed); phase 1
        # writes each tile exactly once -> a single lane-dense HBM writeback.
        out_specs=pl.BlockSpec((BB, R, Cout), lambda b, p, t: (b, t * p, 0)),
        scratch_shapes=[pltpu.VMEM((BB, 1, Cout), jnp.float32),
                        pltpu.VMEM((BB, 1, Cout), jnp.float32)],
        compiler_params=pltpu.CompilerParams(
            dimension_semantics=("parallel", "arbitrary", "arbitrary"),
            vmem_limit_bytes=32 * 1024 * 1024),
        cost_estimate=pl.CostEstimate(
            flops=2 * 2 * B * T_rows * KC * SC * Cout,   # conv recomputed per phase
            transcendentals=2 * B * T_rows * Cout,       # exp + reciprocal in GELU
            bytes_accessed=2 * in_bytes + out_bytes
                           + w_j.size * w_j.dtype.itemsize),
    )(x5, halo, w_j, g3, b3)

    out_btc = out_btc[:, :T_out, :]                      # drop padded rows
    if channels_last:
        return out_btc
    # PyTorch-compatible NCW layout.  TODO(synk): keep channel-last through the
    # consumer (or do an in-kernel XLU transpose) to save this extra HBM pass.
    return jnp.transpose(out_btc, (0, 2, 1))             # (B, C_out, T_out)


if __name__ == "__main__":
    key = jax.random.PRNGKey(0)
    kx, kw = jax.random.split(key)

    # Module hard-codes in_d=58; only the first conv layer (512, 10, 5) runs.
    B, Cin, T = 2, 58, 64
    Cout, K, stride = 512, 10, 5

    x = jax.random.normal(kx, (B, Cin, T), dtype=jnp.float32)
    fan_in = Cin * K   # kaiming_normal_ (fan_in mode, gain=sqrt(2)), no bias
    w = jax.random.normal(kw, (Cout, Cin, K), dtype=jnp.float32) * jnp.sqrt(
        2.0 / fan_in).astype(jnp.float32)
    gamma = jnp.ones((Cout,), jnp.float32)   # GroupNorm affine defaults
    beta = jnp.zeros((Cout,), jnp.float32)

    out = conv_feature_extraction(x, w, gamma, beta, stride=stride)
    jax.block_until_ready(out)

    T_out = (T - K) // stride + 1
    assert out.shape == (B, Cout, T_out), out.shape

    # Pure-JAX reference (with the same bf16 input quantization the kernel uses).
    xq = x.astype(jnp.bfloat16).astype(jnp.float32)
    wq = w.astype(jnp.bfloat16).astype(jnp.float32)
    last = (T_out - 1) * stride
    cols = [xq[:, :, k:last + k + 1:stride] for k in range(K)]   # (B,Cin,T_out)
    patches = jnp.stack(cols, axis=-1)                           # (B,Cin,T_out,K)
    y = jnp.einsum('bitk,oik->bot', patches, wq,
                   preferred_element_type=jnp.float32)
    mean = y.mean(axis=2, keepdims=True)
    var = y.var(axis=2, keepdims=True)
    yn = (y - mean) * jax.lax.rsqrt(var + EPS)
    yn = yn * gamma[None, :, None] + beta[None, :, None]
    ref = jax.nn.gelu(yn, approximate=False)

    err = float(jnp.max(jnp.abs(out.astype(jnp.float32) - ref)))
    assert err < 5e-2, f"max abs err {err}"
    print("KERNEL_OK")
</pallas_src>

<mosaic_0001>
module attributes {stable_mosaic.version = 11 : i64} {
  func.func @conv_gn_gelu_kernel(%arg0: i32, %arg1: i32, %arg2: i32, %arg3: memref<1x16x290xbf16, #tpu.memory_space<vmem>>, %arg4: memref<1x1x1x290xbf16, #tpu.memory_space<vmem>>, %arg5: memref<2x290x512xbf16, #tpu.memory_space<vmem>>, %arg6: memref<1x1x512xf32, #tpu.memory_space<vmem>>, %arg7: memref<1x1x512xf32, #tpu.memory_space<vmem>>, %arg8: memref<1x16x512xf32, #tpu.memory_space<vmem>>, %arg9: memref<1x1x512xf32, #tpu.memory_space<vmem>>, %arg10: memref<1x1x512xf32, #tpu.memory_space<vmem>>) attributes {dimension_semantics = [#tpu.dimension_semantics<parallel>, #tpu.dimension_semantics<arbitrary>, #tpu.dimension_semantics<arbitrary>], iteration_bounds = array<i64: 2, 2, 1>, scalar_prefetch = 0 : i64, scratch_operands = 2 : i64, tpu.core_type = #tpu.core_type<tc>, window_params = [{transform_indices = @transform_0, window_bounds = array<i64: 1, 16, 290>}, {transform_indices = @transform_1, window_bounds = array<i64: 1, 1, 1, 290>}, {pipeline_mode = #tpu.pipeline_mode<synchronous>, transform_indices = @transform_2, window_bounds = array<i64: 2, 290, 512>}, {pipeline_mode = #tpu.pipeline_mode<synchronous>, transform_indices = @transform_3, window_bounds = array<i64: 1, 1, 512>}, {pipeline_mode = #tpu.pipeline_mode<synchronous>, transform_indices = @transform_4, window_bounds = array<i64: 1, 1, 512>}, {transform_indices = @transform_5, window_bounds = array<i64: 1, 16, 512>}]} {
    %c0_i32 = arith.constant 0 : i32
    %0 = arith.cmpi eq, %arg1, %c0_i32 : i32
    %c0_i32_0 = arith.constant 0 : i32
    %1 = arith.cmpi eq, %arg2, %c0_i32_0 : i32
    %2 = arith.andi %0, %1 : i1
    %3 = arith.extui %2 : i1 to i32
    %c0_i32_1 = arith.constant 0 : i32
    %4 = arith.cmpi ne, %3, %c0_i32_1 : i32
    scf.if %4 {
      %cst_17 = arith.constant 0.000000e+00 : f32
      %24 = vector.broadcast %cst_17 : f32 to vector<1x1x512xf32>
      %c0_18 = arith.constant 0 : index
      %c0_19 = arith.constant 0 : index
      %c0_20 = arith.constant 0 : index
      %25 = vector.load %arg9[%c0_18, %c0_19, %c0_20] : memref<1x1x512xf32, #tpu.memory_space<vmem>>, vector<1x1x512xf32>
      tpu.vector_store %arg9[%c0_18, %c0_19, %c0_20], %24 {strides = array<i32>} : memref<1x1x512xf32, #tpu.memory_space<vmem>>, vector<1x1x512xf32>,
      %cst_21 = arith.constant 0.000000e+00 : f32
      %26 = vector.broadcast %cst_21 : f32 to vector<1x1x512xf32>
      %c0_22 = arith.constant 0 : index
      %c0_23 = arith.constant 0 : index
      %c0_24 = arith.constant 0 : index
      %27 = vector.load %arg10[%c0_22, %c0_23, %c0_24] : memref<1x1x512xf32, #tpu.memory_space<vmem>>, vector<1x1x512xf32>
      tpu.vector_store %arg10[%c0_22, %c0_23, %c0_24], %26 {strides = array<i32>} : memref<1x1x512xf32, #tpu.memory_space<vmem>>, vector<1x1x512xf32>,
    } else {
    }
    %c0 = arith.constant 0 : index
    %c0_2 = arith.constant 0 : index
    %c0_3 = arith.constant 0 : index
    %5 = vector.load %arg3[%c0, %c0_2, %c0_3] : memref<1x16x290xbf16, #tpu.memory_space<vmem>>, vector<1x16x290xbf16>
    %c0_4 = arith.constant 0 : index
    %c0_5 = arith.constant 0 : index
    %c0_6 = arith.constant 0 : index
    %c0_7 = arith.constant 0 : index
    %6 = vector.load %arg4[%c0_4, %c0_5, %c0_6, %c0_7] : memref<1x1x1x290xbf16, #tpu.memory_space<vmem>>, vector<1x1x1x290xbf16>
    %7 = vector.shape_cast %6 : vector<1x1x1x290xbf16> to vector<1x1x290xbf16>
    %8 = tpu.concatenate %5, %7 in 1 : vector<1x16x290xbf16>, vector<1x1x290xbf16> -> vector<1x17x290xbf16>
    %c0_8 = arith.constant 0 : index
    %c0_9 = arith.constant 0 : index
    %c0_10 = arith.constant 0 : index
    %9 = vector.load %arg5[%c0_8, %c0_9, %c0_10] : memref<2x290x512xbf16, #tpu.memory_space<vmem>>, vector<1x290x512xbf16>
    %10 = vector.shape_cast %9 : vector<1x290x512xbf16> to vector<290x512xbf16>
    "tpu.trace_start"() <{level = 10 : i32, message = "brk,kc->brc"}> : () -> ()
    %cst = arith.constant dense<0.000000e+00> : vector<1x17x512xf32>
    %11 = tpu.matmul %8, %10, %cst {dimension_numbers = #tpu.dot_dimension_numbers<[2], [0], [0, 1], [1], [0, 0, 0, 1, 1, 1], [], []>} : vector<1x17x290xbf16>, vector<290x512xbf16>, vector<1x17x512xf32> -> vector<1x17x512xf32>
    "tpu.trace_stop"() : () -> ()
    %12 = vector.extract_strided_slice %11 {offsets = [0, 0, 0], sizes = [1, 16, 512], strides = [1, 1, 1]} : vector<1x17x512xf32> to vector<1x16x512xf32>
    %c1 = arith.constant 1 : index
    %c0_11 = arith.constant 0 : index
    %c0_12 = arith.constant 0 : index
    %13 = vector.load %arg5[%c1, %c0_11, %c0_12] : memref<2x290x512xbf16, #tpu.memory_space<vmem>>, vector<1x290x512xbf16>
    %14 = vector.shape_cast %13 : vector<1x290x512xbf16> to vector<290x512xbf16>
    "tpu.trace_start"() <{level = 10 : i32, message = "brk,kc->brc"}> : () -> ()
    %cst_13 = arith.constant dense<0.000000e+00> : vector<1x17x512xf32>
    %15 = tpu.matmul %8, %14, %cst_13 {dimension_numbers = #tpu.dot_dimension_numbers<[2], [0], [0, 1], [1], [0, 0, 0, 1, 1, 1], [], []>} : vector<1x17x290xbf16>, vector<290x512xbf16>, vector<1x17x512xf32> -> vector<1x17x512xf32>
    "tpu.trace_stop"() : () -> ()
    %16 = vector.extract_strided_slice %15 {offsets = [0, 1, 0], sizes = [1, 16, 512], strides = [1, 1, 1]} : vector<1x17x512xf32> to vector<1x16x512xf32>
    %17 = arith.addf %12, %16 : vector<1x16x512xf32>
    %c0_i32_14 = arith.constant 0 : i32
    %18 = arith.cmpi eq, %arg1, %c0_i32_14 : i32
    %19 = arith.extui %18 : i1 to i32
    %c0_i32_15 = arith.constant 0 : i32
    %20 = arith.cmpi ne, %19, %c0_i32_15 : i32
    scf.if %20 {
      %c16_i32 = arith.constant 16 : i32
      %24 = arith.muli %arg2, %c16_i32 : i32
      %25 = tpu.iota {dimensions = array<i32: 1>} : vector<1x16x1xi32>
      %26 = vector.broadcast %24 : i32 to vector<1x16x1xi32>
      %27 = arith.addi %26, %25 : vector<1x16x1xi32>
      %c11_i32 = arith.constant 11 : i32
      %28 = vector.broadcast %c11_i32 : i32 to vector<1x16x1xi32>
      %29 = arith.cmpi slt, %27, %28 : vector<1x16x1xi32>
      %30 = arith.extui %29 : vector<1x16x1xi1> to vector<1x16x1xi32>
      %31 = arith.sitofp %30 : vector<1x16x1xi32> to vector<1x16x1xf32>
      %32 = vector.broadcast %31 : vector<1x16x1xf32> to vector<1x16x512xf32>
      %33 = arith.mulf %17, %32 : vector<1x16x512xf32>
      %c0_17 = arith.constant 0 : index
      %c0_18 = arith.constant 0 : index
      %c0_19 = arith.constant 0 : index
      %34 = vector.load %arg9[%c0_17, %c0_18, %c0_19] : memref<1x1x512xf32, #tpu.memory_space<vmem>>, vector<1x1x512xf32>
      %cst_20 = arith.constant dense<0.000000e+00> : vector<1x512xf32>
      %35 = vector.multi_reduction <add>, %33, %cst_20 [1] : vector<1x16x512xf32> to vector<1x512xf32>
      %36 = vector.shape_cast %35 : vector<1x512xf32> to vector<1x1x512xf32>
      %37 = arith.addf %34, %36 : vector<1x1x512xf32>
      %c0_21 = arith.constant 0 : index
      %c0_22 = arith.constant 0 : index
      %c0_23 = arith.constant 0 : index
      %38 = vector.load %arg9[%c0_21, %c0_22, %c0_23] : memref<1x1x512xf32, #tpu.memory_space<vmem>>, vector<1x1x512xf32>
      tpu.vector_store %arg9[%c0_21, %c0_22, %c0_23], %37 {strides = array<i32>} : memref<1x1x512xf32, #tpu.memory_space<vmem>>, vector<1x1x512xf32>,
      %c0_24 = arith.constant 0 : index
      %c0_25 = arith.constant 0 : index
      %c0_26 = arith.constant 0 : index
      %39 = vector.load %arg10[%c0_24, %c0_25, %c0_26] : memref<1x1x512xf32, #tpu.memory_space<vmem>>, vector<1x1x512xf32>
      %40 = arith.mulf %33, %33 : vector<1x16x512xf32>
      %cst_27 = arith.constant dense<0.000000e+00> : vector<1x512xf32>
      %41 = vector.multi_reduction <add>, %40, %cst_27 [1] : vector<1x16x512xf32> to vector<1x512xf32>
      %42 = vector.shape_cast %41 : vector<1x512xf32> to vector<1x1x512xf32>
      %43 = arith.addf %39, %42 : vector<1x1x512xf32>
      %c0_28 = arith.constant 0 : index
      %c0_29 = arith.constant 0 : index
      %c0_30 = arith.constant 0 : index
      %44 = vector.load %arg10[%c0_28, %c0_29, %c0_30] : memref<1x1x512xf32, #tpu.memory_space<vmem>>, vector<1x1x512xf32>
      tpu.vector_store %arg10[%c0_28, %c0_29, %c0_30], %43 {strides = array<i32>} : memref<1x1x512xf32, #tpu.memory_space<vmem>>, vector<1x1x512xf32>,
    } else {
    }
    %c1_i32 = arith.constant 1 : i32
    %21 = arith.cmpi eq, %arg1, %c1_i32 : i32
    %22 = arith.extui %21 : i1 to i32
    %c0_i32_16 = arith.constant 0 : i32
    %23 = arith.cmpi ne, %22, %c0_i32_16 : i32
    scf.if %23 {
      %c0_17 = arith.constant 0 : index
      %c0_18 = arith.constant 0 : index
      %c0_19 = arith.constant 0 : index
      %24 = vector.load %arg9[%c0_17, %c0_18, %c0_19] : memref<1x1x512xf32, #tpu.memory_space<vmem>>, vector<1x1x512xf32>
      %cst_20 = arith.constant 0.0909090936 : f32
      %25 = vector.broadcast %cst_20 : f32 to vector<1x1x512xf32>
      %26 = arith.mulf %24, %25 : vector<1x1x512xf32>
      %c0_21 = arith.constant 0 : index
      %c0_22 = arith.constant 0 : index
      %c0_23 = arith.constant 0 : index
      %27 = vector.load %arg10[%c0_21, %c0_22, %c0_23] : memref<1x1x512xf32, #tpu.memory_space<vmem>>, vector<1x1x512xf32>
      %cst_24 = arith.constant 0.0909090936 : f32
      %28 = vector.broadcast %cst_24 : f32 to vector<1x1x512xf32>
      %29 = arith.mulf %27, %28 : vector<1x1x512xf32>
      %30 = arith.mulf %26, %26 : vector<1x1x512xf32>
      %31 = arith.subf %29, %30 : vector<1x1x512xf32>
      %cst_25 = arith.constant 0.000000e+00 : f32
      %32 = vector.broadcast %cst_25 : f32 to vector<1x1x512xf32>
      %33 = arith.maximumf %31, %32 : vector<1x1x512xf32>
      %c0_26 = arith.constant 0 : index
      %c0_27 = arith.constant 0 : index
      %c0_28 = arith.constant 0 : index
      %34 = vector.load %arg6[%c0_26, %c0_27, %c0_28] : memref<1x1x512xf32, #tpu.memory_space<vmem>>, vector<1x1x512xf32>
      %cst_29 = arith.constant 9.99999974E-6 : f32
      %35 = vector.broadcast %cst_29 : f32 to vector<1x1x512xf32>
      %36 = arith.addf %33, %35 : vector<1x1x512xf32>
      %37 = math.rsqrt %36 : vector<1x1x512xf32>
      %38 = arith.mulf %34, %37 : vector<1x1x512xf32>
      %c0_30 = arith.constant 0 : index
      %c0_31 = arith.constant 0 : index
      %c0_32 = arith.constant 0 : index
      %39 = vector.load %arg7[%c0_30, %c0_31, %c0_32] : memref<1x1x512xf32, #tpu.memory_space<vmem>>, vector<1x1x512xf32>
      %40 = arith.mulf %26, %38 : vector<1x1x512xf32>
      %41 = arith.subf %39, %40 : vector<1x1x512xf32>
      %42 = vector.broadcast %38 : vector<1x1x512xf32> to vector<1x16x512xf32>
      %43 = arith.mulf %17, %42 : vector<1x16x512xf32>
      %44 = vector.broadcast %41 : vector<1x1x512xf32> to vector<1x16x512xf32>
      %45 = arith.addf %43, %44 : vector<1x16x512xf32>
      %46 = math.absf %45 : vector<1x16x512xf32>
      %cst_33 = arith.constant 0.231641889 : f32
      %47 = vector.broadcast %cst_33 : f32 to vector<1x16x512xf32>
      %48 = arith.mulf %47, %46 : vector<1x16x512xf32>
      %cst_34 = arith.constant 1.000000e+00 : f32
      %49 = vector.broadcast %cst_34 : f32 to vector<1x16x512xf32>
      %50 = arith.addf %49, %48 : vector<1x16x512xf32>
      %51 = tpu.reciprocal %50 {approx = true} : vector<1x16x512xf32> -> vector<1x16x512xf32>
      %cst_35 = arith.constant 0.53070271 : f32
      %52 = vector.broadcast %cst_35 : f32 to vector<1x16x512xf32>
      %53 = arith.mulf %52, %51 : vector<1x16x512xf32>
      %cst_36 = arith.constant -0.72657603 : f32
      %54 = vector.broadcast %cst_36 : f32 to vector<1x16x512xf32>
      %55 = arith.addf %53, %54 : vector<1x16x512xf32>
      %56 = arith.mulf %55, %51 : vector<1x16x512xf32>
      %cst_37 = arith.constant 0.710706889 : f32
      %57 = vector.broadcast %cst_37 : f32 to vector<1x16x512xf32>
      %58 = arith.addf %56, %57 : vector<1x16x512xf32>
      %59 = arith.mulf %58, %51 : vector<1x16x512xf32>
      %cst_38 = arith.constant -0.142248362 : f32
      %60 = vector.broadcast %cst_38 : f32 to vector<1x16x512xf32>
      %61 = arith.addf %59, %60 : vector<1x16x512xf32>
      %62 = arith.mulf %61, %51 : vector<1x16x512xf32>
      %cst_39 = arith.constant 0.127414793 : f32
      %63 = vector.broadcast %cst_39 : f32 to vector<1x16x512xf32>
      %64 = arith.addf %62, %63 : vector<1x16x512xf32>
      %65 = arith.mulf %64, %51 : vector<1x16x512xf32>
      %cst_40 = arith.constant 0.000000e+00 : f32
      %66 = vector.broadcast %cst_40 : f32 to vector<1x16x512xf32>
      %67 = arith.maximumf %45, %66 : vector<1x16x512xf32>
      %68 = arith.mulf %46, %65 : vector<1x16x512xf32>
      %cst_41 = arith.constant -5.000000e-01 : f32
      %69 = vector.broadcast %cst_41 : f32 to vector<1x16x512xf32>
      %70 = arith.mulf %69, %45 : vector<1x16x512xf32>
      %71 = arith.mulf %70, %45 : vector<1x16x512xf32>
      %72 = math.exp %71 : vector<1x16x512xf32>
      %73 = arith.mulf %68, %72 : vector<1x16x512xf32>
      %74 = arith.subf %67, %73 : vector<1x16x512xf32>
      %c0_42 = arith.constant 0 : index
      %c0_43 = arith.constant 0 : index
      %c0_44 = arith.constant 0 : index
      %75 = vector.load %arg8[%c0_42, %c0_43, %c0_44] : memref<1x16x512xf32, #tpu.memory_space<vmem>>, vector<1x16x512xf32>
      tpu.vector_store %arg8[%c0_42, %c0_43, %c0_44], %74 {strides = array<i32>} : memref<1x16x512xf32, #tpu.memory_space<vmem>>, vector<1x16x512xf32>,
    } else {
    }
    return
  }
  func.func @transform_0(%arg0: i32, %arg1: i32, %arg2: i32) -> (i32, i32, i32) {
    %c0_i32 = arith.constant 0 : i32
    %c0_i32_0 = arith.constant 0 : i32
    return %arg0, %arg2, %c0_i32 : i32, i32, i32
  }
  func.func @transform_1(%arg0: i32, %arg1: i32, %arg2: i32) -> (i32, i32, i32, i32) {
    %c0_i32 = arith.constant 0 : i32
    %c0_i32_0 = arith.constant 0 : i32
    %c0_i32_1 = arith.constant 0 : i32
    return %arg0, %arg2, %c0_i32, %c0_i32_0 : i32, i32, i32, i32
  }
  func.func @transform_2(%arg0: i32, %arg1: i32, %arg2: i32) -> (i32, i32, i32) {
    %c0_i32 = arith.constant 0 : i32
    %c0_i32_0 = arith.constant 0 : i32
    %c0_i32_1 = arith.constant 0 : i32
    %c0_i32_2 = arith.constant 0 : i32
    return %c0_i32, %c0_i32_0, %c0_i32_1 : i32, i32, i32
  }
  func.func @transform_3(%arg0: i32, %arg1: i32, %arg2: i32) -> (i32, i32, i32) {
    %c0_i32 = arith.constant 0 : i32
    %c0_i32_0 = arith.constant 0 : i32
    %c0_i32_1 = arith.constant 0 : i32
    %c0_i32_2 = arith.constant 0 : i32
    return %c0_i32, %c0_i32_0, %c0_i32_1 : i32, i32, i32
  }
  func.func @transform_4(%arg0: i32, %arg1: i32, %arg2: i32) -> (i32, i32, i32) {
    %c0_i32 = arith.constant 0 : i32
    %c0_i32_0 = arith.constant 0 : i32
    %c0_i32_1 = arith.constant 0 : i32
    %c0_i32_2 = arith.constant 0 : i32
    return %c0_i32, %c0_i32_0, %c0_i32_1 : i32, i32, i32
  }
  func.func @transform_5(%arg0: i32, %arg1: i32, %arg2: i32) -> (i32, i32, i32) {
    %0 = arith.muli %arg2, %arg1 : i32
    %c0_i32 = arith.constant 0 : i32
    %c0_i32_0 = arith.constant 0 : i32
    return %arg0, %0, %c0_i32 : i32, i32, i32
  }
}

</mosaic_0001>

<bundles_post_ra>
// kernel: conv_feature_extraction.1
= control target key start
LH: loop header
LB: loop body
LE: loop exit
PB: predicated region body
PF: predicated region fallthrough
CT: control target
= control target key end

     0   :  { %s2961_s18 = smov 0   ;;  %s2963_s19 = smov 0   ;;  %s3760_s0 = inlined_call_operand.vmem [shape: bf16[2,17,290], index: 0, kind: input, shape index: {}]   ;;  %s3761_s1 = inlined_call_operand.vmem [shape: bf16[2,1,1,290], index: 1, kind: input, shape index: {}]   ;;  %s3762_s2 = inlined_call_operand.vmem [shape: bf16[2,290,512], index: 2, kind: input, shape index: {}]   ;;  %s3763_s3 = inlined_call_operand.vmem [shape: f32[1,1,512], index: 3, kind: input, shape index: {}]   ;;  %s3764_s4 = inlined_call_operand.vmem [shape: f32[1,1,512], index: 4, kind: input, shape index: {}]   ;;  %s3765_s5 = inlined_call_operand.vmem [shape: f32[2,16,512], index: 5, kind: output, shape index: {}]  }
   0x1   :  { %s2965_s20 = smov 0   ;;  %s2967_s21 = smov 0  }
   0x2   :  { %s2969_s22 = smov 0  }
   0x3 LB: > { %s30_s23 = sadd.s32 1, %s2917_s20  ;;  %s34_s24 = sadd.s32 1, %s2921_s21  ;;  %s2925_s22 = sphi %s2969_s22, %s15_s22   ;;  %s2921_s21 = sphi %s2967_s21, %s3769_s21   ;;  %s2917_s20 = sphi %s2965_s20, %s3768_s20   ;;  %s2913_s19 = sphi %s2963_s19, %s3767_s19   ;;  %s2909_s18 = sphi %s2961_s18, %s3766_s18  }
   0x4   : > { %p32_p0 = scmp.ge.s32.totalorder %s30_s23, 2  ;;  %p2301_p1 = scmp.ge.s32.totalorder %s2925_s22, 1 }
   0x5   : > { %p243_p2 = scmp.lt.s32.totalorder %s2925_s22, 5 }
   0x6   : > { %s3771_s23 = smov (%p32_p0, %s30_s23), 0  ;;  %s3773_s24 = smov (!%p32_p0, %s34_s24), %s2921_s21 }
   0x7   : > { %p244_p3 = pnand %p2301_p1, %p243_p2  ;;  %p36_p4 = scmp.ge.s32.totalorder %s3773_s24, 2 }
   0x8   : > { %p301_p5 = scmp.lt.s32.totalorder (!%p244_p3), %s2913_s19, 1  ;;  %p338_p6 = scmp.eq.s32.totalorder (!%p244_p3), %s2909_s18, 0 }
   0x9   : > { %s3775_s24 = smov (%p36_p4, %s3773_s24), 0  ;;  %247 = sbr.rel (%p244_p3) target bundleno = 529 (0x211), region = 40 }
  0x10   : > { %s3777_s19 = smov (!%p301_p5, %s2913_s19), 1  ;;  %343 = sbr.rel (!%p338_p6) target bundleno = 23 (0x17), region = 44 }
  0x11   : > { %s2579_s25 = smul.u32 36, %s3777_s19  ;;  %s2553_s26 = sshll.u32 %s3777_s19, 6  ;;  %v344_v0 = vlaneseq (%p338_p6)  ;;  %v2927_v1 = vmov (%p338_p6), 0.0  }
  0x12   : > { %s2580_s27 = smul.u32 3, %s3777_s19  ;;  %s2997_s30 = scalar_lea.vmem %s3765_s5, %s2553_s26 }
  0x13   : > { %s3002_s8 = scalar_lea.vmem %s3760_s0, %s2579_s25  ;;  %vm346_vm0 = vcmp.lt.s32.totalorder (%p338_p6), %v344_v0, 512 }
  0x14   : > { %s3007_s11 = scalar_lea.vmem %s3761_s1, %s2580_s27  ;;  %348 = vst.msk [vmem:[#allocation2] sm:$0xf] (%p338_p6), %vm346_vm0, %v2927_v1  ;;  %349 = vst.msk [vmem:[#allocation3] sm:$0xf] (%p338_p6), %vm346_vm0, %v2927_v1 }
  0x17 PF: > { %v2625_v2 = vld [vmem:[%s3762_s2 + $0x4] ss:$16 sps:$4 sm:$0xff]   ;;  %v2627_v3 = vld [vmem:[%s3762_s2 + $0xc] ss:$16 sps:$4 sm:$0xff]   ;;  %v2629_v4 = vld [vmem:[%s3762_s2] ss:$16 sps:$4 sm:$0xff]   ;;  %v382_v63 = vlaneseq }
  0x18   : > { %860 = vmatprep.subr.bf16.mxu0 %v2625_v2  ;;  %v2630_v5 = vld [vmem:[%s3762_s2 + $0x8] ss:$16 sps:$4 sm:$0xff]   ;;  %958 = vmatprep.subr.bf16.mxu1 %v2627_v3  ;;  %v2631_v6 = vld [vmem:[%s3762_s2 + $0x24] ss:$16 sps:$4 sm:$0xff]   ;;  %v2633_v7 = vld [vmem:[%s3762_s2 + $0x2c] ss:$16 sps:$4 sm:$0xff]  }
  0x19   : > { %861 = vmatpush1.bf16.msra.mxu0 %v2629_v4  ;;  %959 = vmatpush1.bf16.msra.mxu1 %v2630_v5  ;;  %v2635_v8 = vld [vmem:[%s3762_s2 + $0x20] ss:$16 sps:$4 sm:$0xff]   ;;  %v2636_v9 = vld [vmem:[%s3762_s2 + $0x28] ss:$16 sps:$4 sm:$0xff]   ;;  %v2637_v10 = vld [vmem:[%s3762_s2 + $0x44] ss:$16 sps:$4 sm:$0xff]  }
  0x1a   : > { %862 = vmatprep.subr.bf16.mxu0 %v2631_v6  ;;  %960 = vmatprep.subr.bf16.mxu1 %v2633_v7  ;;  %v2639_v11 = vld [vmem:[%s3762_s2 + $0x4c] ss:$16 sps:$4 sm:$0xff]   ;;  %v2641_v12 = vld [vmem:[%s3762_s2 + $0x40] ss:$16 sps:$4 sm:$0xff]   ;;  %v2642_v13 = vld [vmem:[%s3762_s2 + $0x48] ss:$16 sps:$4 sm:$0xff]  }
  0x1b   : > { %v2643_v14 = vld [vmem:[%s3762_s2 + $0x64] ss:$16 sps:$4 sm:$0xff]   ;;  %v2645_v15 = vld [vmem:[%s3762_s2 + $0x6c] ss:$16 sps:$4 sm:$0xff]   ;;  %v2647_v16 = vld [vmem:[%s3762_s2 + $0x60] ss:$16 sps:$4 sm:$0xff]  }
  0x1c   : > { %v2648_v17 = vld [vmem:[%s3762_s2 + $0x68] ss:$16 sps:$4 sm:$0xff]   ;;  %v2649_v18 = vld [vmem:[%s3762_s2 + $0x84] ss:$16 sps:$4 sm:$0xff]   ;;  %v2651_v19 = vld [vmem:[%s3762_s2 + $0x8c] ss:$16 sps:$4 sm:$0xff]  }
  0x1d   : > { %863 = vmatpush1.bf16.msra.mxu0 %v2635_v8  ;;  %961 = vmatpush1.bf16.msra.mxu1 %v2636_v9  ;;  %v2653_v20 = vld [vmem:[%s3762_s2 + $0x80] ss:$16 sps:$4 sm:$0xff]   ;;  %v2654_v21 = vld [vmem:[%s3762_s2 + $0x88] ss:$16 sps:$4 sm:$0xff]   ;;  %v2655_v22 = vld [vmem:[%s3762_s2 + $0xa4] ss:$16 sps:$4 sm:$0xff]  }
  0x1e   : > { %864 = vmatprep.subr.bf16.mxu0 %v2637_v10  ;;  %962 = vmatprep.subr.bf16.mxu1 %v2639_v11  ;;  %v2657_v23 = vld [vmem:[%s3762_s2 + $0xac] ss:$16 sps:$4 sm:$0xff]   ;;  %v2659_v24 = vld [vmem:[%s3762_s2 + $0xa0] ss:$16 sps:$4 sm:$0xff]   ;;  %v2660_v25 = vld [vmem:[%s3762_s2 + $0xa8] ss:$16 sps:$4 sm:$0xff]  }
  0x1f   : > { %v2661_v26 = vld [vmem:[%s3762_s2 + $0xc4] ss:$16 sps:$4 sm:$0xff]   ;;  %v2663_v27 = vld [vmem:[%s3762_s2 + $0xcc] ss:$16 sps:$4 sm:$0xff]   ;;  %v2665_v28 = vld [vmem:[%s3762_s2 + $0xc0] ss:$16 sps:$4 sm:$0xff]  }
  0x20   : > { %v2666_v29 = vld [vmem:[%s3762_s2 + $0xc8] ss:$16 sps:$4 sm:$0xff]   ;;  %v2667_v30 = vld [vmem:[%s3762_s2 + $0xe4] ss:$16 sps:$4 sm:$0xff]   ;;  %v2669_v31 = vld [vmem:[%s3762_s2 + $0xec] ss:$16 sps:$4 sm:$0xff]  }
  0x21   : > { %865 = vmatpush1.bf16.msra.mxu0 %v2641_v12  ;;  %963 = vmatpush1.bf16.msra.mxu1 %v2642_v13  ;;  %v2671_v32 = vld [vmem:[%s3762_s2 + $0xe0] ss:$16 sps:$4 sm:$0xff]   ;;  %v2672_v33 = vld [vmem:[%s3762_s2 + $0xe8] ss:$16 sps:$4 sm:$0xff]   ;;  %v2673_v34 = vld [vmem:[%s3762_s2 + $0x104] ss:$16 sps:$4 sm:$0xff]  }
  0x22   : > { %866 = vmatprep.subr.bf16.mxu0 %v2643_v14  ;;  %964 = vmatprep.subr.bf16.mxu1 %v2645_v15  ;;  %v2675_v35 = vld [vmem:[%s3762_s2 + $0x10c] ss:$16 sps:$4 sm:$0xff]   ;;  %v2677_v36 = vld [vmem:[%s3762_s2 + $0x100] ss:$16 sps:$4 sm:$0xff]   ;;  %v2678_v37 = vld [vmem:[%s3762_s2 + $0x108] ss:$16 sps:$4 sm:$0xff]  }
  0x23   : > { %v2679_v38 = vld [vmem:[%s3762_s2 + $0x124] ss:$16 sps:$4 sm:$0xff]   ;;  %v2681_v39 = vld [vmem:[%s3762_s2 + $0x12c] ss:$16 sps:$4 sm:$0xff]   ;;  %v2683_v40 = vld [vmem:[%s3762_s2 + $0x120] ss:$16 sps:$4 sm:$0xff]  }
  0x24   : > { %v2684_v41 = vld [vmem:[%s3762_s2 + $0x128] ss:$16 sps:$4 sm:$0xff]   ;;  %v2685_v42 = vld [vmem:[%s3762_s2 + $0x144] ss:$16 sps:$4 sm:$0xff]   ;;  %v2687_v43 = vld [vmem:[%s3762_s2 + $0x14c] ss:$16 sps:$4 sm:$0xff]  }
  0x25   : > { %867 = vmatpush1.bf16.msra.mxu0 %v2647_v16  ;;  %965 = vmatpush1.bf16.msra.mxu1 %v2648_v17  ;;  %v2689_v44 = vld [vmem:[%s3762_s2 + $0x140] ss:$16 sps:$4 sm:$0xff]   ;;  %v2690_v45 = vld [vmem:[%s3762_s2 + $0x148] ss:$16 sps:$4 sm:$0xff]   ;;  %v2691_v46 = vld [vmem:[%s3762_s2 + $0x164] ss:$16 sps:$4 sm:$0xff]  }
  0x26   : > { %868 = vmatprep.subr.bf16.mxu0 %v2649_v18  ;;  %966 = vmatprep.subr.bf16.mxu1 %v2651_v19  ;;  %v2693_v47 = vld [vmem:[%s3762_s2 + $0x16c] ss:$16 sps:$4 sm:$0xff]   ;;  %v2695_v48 = vld [vmem:[%s3762_s2 + $0x160] ss:$16 sps:$4 sm:$0xff]   ;;  %v2696_v49 = vld [vmem:[%s3762_s2 + $0x168] ss:$16 sps:$4 sm:$0xff]  }
  0x27   : > { %v3154_v50 = vld [vmem:[%s3002_s8 + $0x4] ss:$12 sps:$4 sm:$0xff]   ;;  %v2699_v52 = vld [vmem:[%s3762_s2 + $0x18c] ss:$16 sps:$4 sm:$0xff]   ;;  %v2702_v54 = vld [vmem:[%s3762_s2 + $0x188] ss:$16 sps:$4 sm:$0xff]  }
  0x28   : > { %v2697_v51 = vld [vmem:[%s3762_s2 + $0x184] ss:$16 sps:$4 sm:$0xff]   ;;  %892 = vmatprep.mubr.bf16.mxu0 %v3154_v50  ;;  %990 = vmatprep.mubr.bf16.mxu1 %v3154_v50  ;;  %v2701_v53 = vld [vmem:[%s3762_s2 + $0x180] ss:$16 sps:$4 sm:$0xff]   ;;  %v2705_v56 = vld [vmem:[%s3762_s2 + $0x1ac] ss:$16 sps:$4 sm:$0xff]  }
  0x29   : > { %869 = vmatpush1.bf16.msra.mxu0 %v2653_v20  ;;  %967 = vmatpush1.bf16.msra.mxu1 %v2654_v21  ;;  %v2703_v55 = vld [vmem:[%s3762_s2 + $0x1a4] ss:$16 sps:$4 sm:$0xff]   ;;  %v2707_v57 = vld [vmem:[%s3762_s2 + $0x1a0] ss:$16 sps:$4 sm:$0xff]   ;;  %v2708_v58 = vld [vmem:[%s3762_s2 + $0x1a8] ss:$16 sps:$4 sm:$0xff]  }
  0x2a   : > { %870 = vmatprep.subr.bf16.mxu0 %v2655_v22  ;;  %968 = vmatprep.subr.bf16.mxu1 %v2657_v23  ;;  %v2709_v59 = vld [vmem:[%s3762_s2 + $0x1c4] ss:$16 sps:$4 sm:$0xff]   ;;  %v2711_v60 = vld [vmem:[%s3762_s2 + $0x1cc] ss:$16 sps:$4 sm:$0xff]   ;;  %v2928_v61 = vmov 1966171168  }
  0x2b   : > { %v380_v62 = vunpack.c.l.s4 %v2928_v61  ;;  %v2713_v0 = vld [vmem:[%s3762_s2 + $0x1c0] ss:$16 sps:$4 sm:$0xff]   ;;  %v2714_v1 = vld [vmem:[%s3762_s2 + $0x1c8] ss:$16 sps:$4 sm:$0xff]   ;;  %v2715_v2 = vld [vmem:[%s3762_s2 + $0x1e4] ss:$16 sps:$4 sm:$0xff]  }
  0x2c   : > { %v2717_v3 = vld [vmem:[%s3762_s2 + $0x1ec] ss:$16 sps:$4 sm:$0xff]   ;;  %v2719_v4 = vld [vmem:[%s3762_s2 + $0x1e0] ss:$16 sps:$4 sm:$0xff]   ;;  %v2720_v5 = vld [vmem:[%s3762_s2 + $0x1e8] ss:$16 sps:$4 sm:$0xff]  }
  0x2d   : > { %871 = vmatpush1.bf16.msra.mxu0 %v2659_v24  ;;  %969 = vmatpush1.bf16.msra.mxu1 %v2660_v25  ;;  %v381_v6 = vunpack.c.0.s8 %v380_v62  ;;  %v3207_v7 = vshrl.u32 %v382_v63, 7  ;;  %v2309_v8 = vld.sshfl [vmem:[%s3007_s11] sm:$0x13 pattern:$0x75316420]  ;;  %vm847_vm1 = vcmask 1040384  }
  0x2e   : > { %872 = vmatprep.subr.bf16.mxu0 %v2661_v26  ;;  %970 = vmatprep.subr.bf16.mxu1 %v2663_v27  ;;  %v2726_v9 = vld [vmem:[%s3762_s2 + $0x204] ss:$16 sps:$4 sm:$0xff]   ;;  %v2729_v10 = vld [vmem:[%s3762_s2 + $0x20c] ss:$16 sps:$4 sm:$0xff]   ;;  %v2724_v12 = vld [vmem:[%s3762_s2 + $0x200] ss:$16 sps:$4 sm:$0xff]   ;;  %v378_v13 = vcombine.high %v2309_v8, %v2309_v8 }
  0x2f   : > { %v3217_v11 = vld [vmem:[%s3002_s8] ss:$12 sps:$4 sm:$0xff]   ;;  %v3223_v14 = vsub.s32 %v381_v6, %v3207_v7  ;;  %v2727_v15 = vld [vmem:[%s3762_s2 + $0x208] ss:$16 sps:$4 sm:$0xff]   ;;  %v2732_v16 = vld [vmem:[%s3762_s2 + $0x224] ss:$16 sps:$4 sm:$0xff]  }
  0x30   : > { %v2735_v17 = vld [vmem:[%s3762_s2 + $0x22c] ss:$16 sps:$4 sm:$0xff]   ;;  %v468_v18 = vld [vmem:[%s3762_s2 + $0x240] sm:$0x11]  ;;  %v2733_v22 = vld [vmem:[%s3762_s2 + $0x228] ss:$16 sps:$4 sm:$0xff]  }
  0x31   : > { %873 = vmatpush1.bf16.msra.mxu0 %v2665_v28  ;;  %971 = vmatpush1.bf16.msra.mxu1 %v2666_v29  ;;  %v3238_v19 = vrot.slane %v378_v13, %v3223_v14  ;;  %v469_v20 = vld [vmem:[%s3762_s2 + $0x248] sm:$0x11]  ;;  %v2730_v21 = vld [vmem:[%s3762_s2 + $0x220] ss:$16 sps:$4 sm:$0xff]   ;;  %v2383_v23 = vcombine.high %v468_v18, %v468_v18  ;;  %v2382_v25 = vcombine.low %v468_v18, %v468_v18  ;;  %vm840_vm2 = vcmask 277504   ;;  %p2548_p7 = scmp.ne.s32.totalorder %s2909_s18, 0 }
  0x32   : > { %874 = vmatprep.subr.bf16.mxu0 %v2667_v30  ;;  %972 = vmatprep.subr.bf16.mxu1 %v2669_v31  ;;  %v2385_v24 = vcombine.high %v469_v20, %v469_v20  ;;  %v2384_v26 = vcombine.low %v469_v20, %v469_v20  ;;  %v3254_v27 = vrot.slane %v2309_v8, %v3223_v14  ;;  %v2742_v30 = vld [vmem:[%s3762_s2 + $0x254] ss:$16 sps:$4 sm:$0xff]   ;;  %v2745_v31 = vld [vmem:[%s3762_s2 + $0x25c] ss:$16 sps:$4 sm:$0xff]   ;;  %v2807_v20 = vld [vmem:[%s3762_s2 + $0x3b0] ss:$16 sps:$4 sm:$0xff]  }
  0x33   : > { %v849_v28 = vsel %vm847_vm1, %v2382_v25, 0  ;;  %v2785_v61 = vld [vmem:[%s3762_s2 + $0x334] ss:$16 sps:$4 sm:$0xff]   ;;  %v2788_v62 = vld [vmem:[%s3762_s2 + $0x33c] ss:$16 sps:$4 sm:$0xff]   ;;  %vm1729_vm3 = vcmask 1046528  }
  0x34   : > { %v855_v29 = vsel %vm847_vm1, %v2384_v26, 0  ;;  %v2797_v6 = vld [vmem:[%s3762_s2 + $0x374] ss:$16 sps:$4 sm:$0xff]   ;;  %v2800_v8 = vld [vmem:[%s3762_s2 + $0x37c] ss:$16 sps:$4 sm:$0xff]   ;;  %vm1851_vm5 = vcmp.lt.s32.totalorder (!%p2548_p7), %v382_v63, 512 }
  0x35   : > { %875 = vmatpush1.bf16.msra.mxu0 %v2671_v32  ;;  %973 = vmatpush1.bf16.msra.mxu1 %v2672_v33  ;;  %v2929_v32 = vmov 0   ;;  %v2740_v33 = vld [vmem:[%s3762_s2 + $0x250] ss:$16 sps:$4 sm:$0xff]   ;;  %v2806_v13 = vld [vmem:[%s3762_s2 + $0x39c] ss:$16 sps:$4 sm:$0xff]  }
  0x36   : > { %876 = vmatprep.subr.bf16.mxu0 %v2673_v34  ;;  %974 = vmatprep.subr.bf16.mxu1 %v2675_v35  ;;  %v2743_v34 = vld [vmem:[%s3762_s2 + $0x258] ss:$16 sps:$4 sm:$0xff]   ;;  %v2812_v18 = vld [vmem:[%s3762_s2 + $0x3bc] ss:$16 sps:$4 sm:$0xff]   ;;  %v2821_v26 = vld [vmem:[%s3762_s2 + $0x3f4] ss:$16 sps:$4 sm:$0xff]  }
  0x37   : > { %v3277_v35 = vld [vmem:[%s3002_s8 + $0x8] ss:$12 sps:$4 sm:$0xff]  }
  0x38   : > { %v2816_v25 = vld [vmem:[%s3762_s2 + $0x3d8] ss:$16 sps:$4 sm:$0xff]  }
  0x39   : > { %877 = vmatpush1.bf16.msra.mxu0 %v2677_v36  ;;  %975 = vmatpush1.bf16.msra.mxu1 %v2678_v37  ;;  %v2749_v36 = vld [vmem:[%s3762_s2 + $0x274] ss:$16 sps:$4 sm:$0xff]   ;;  %v2752_v37 = vld [vmem:[%s3762_s2 + $0x27c] ss:$16 sps:$4 sm:$0xff]  }
  0x3a   : > { %878 = vmatprep.subr.bf16.mxu0 %v2679_v38  ;;  %976 = vmatprep.subr.bf16.mxu1 %v2681_v39  ;;  %v2747_v38 = vld [vmem:[%s3762_s2 + $0x270] ss:$16 sps:$4 sm:$0xff]   ;;  %v2750_v39 = vld [vmem:[%s3762_s2 + $0x278] ss:$16 sps:$4 sm:$0xff]  }
  0x3d   : > { %879 = vmatpush1.bf16.msra.mxu0 %v2683_v40  ;;  %977 = vmatpush1.bf16.msra.mxu1 %v2684_v41  ;;  %v2755_v40 = vld [vmem:[%s3762_s2 + $0x294] ss:$16 sps:$4 sm:$0xff]   ;;  %v2758_v41 = vld [vmem:[%s3762_s2 + $0x29c] ss:$16 sps:$4 sm:$0xff]  }
  0x3e   : > { %880 = vmatprep.subr.bf16.mxu0 %v2685_v42  ;;  %978 = vmatprep.subr.bf16.mxu1 %v2687_v43  ;;  %v2753_v42 = vld [vmem:[%s3762_s2 + $0x290] ss:$16 sps:$4 sm:$0xff]   ;;  %v2756_v43 = vld [vmem:[%s3762_s2 + $0x298] ss:$16 sps:$4 sm:$0xff]  }
  0x41   : > { %881 = vmatpush1.bf16.msra.mxu0 %v2689_v44  ;;  %979 = vmatpush1.bf16.msra.mxu1 %v2690_v45  ;;  %v3311_v44 = vcombine.high %v3254_v27, %v3254_v27  ;;  %v2761_v45 = vld [vmem:[%s3762_s2 + $0x2b4] ss:$16 sps:$4 sm:$0xff]  }
  0x42   : > { %882 = vmatprep.subr.bf16.mxu0 %v2691_v46  ;;  %980 = vmatprep.subr.bf16.mxu1 %v2693_v47  ;;  %v2764_v46 = vld [vmem:[%s3762_s2 + $0x2bc] ss:$16 sps:$4 sm:$0xff]   ;;  %v2759_v47 = vld [vmem:[%s3762_s2 + $0x2b0] ss:$16 sps:$4 sm:$0xff]  }
  0x45   : > { %883 = vmatpush1.bf16.msra.mxu0 %v2695_v48  ;;  %981 = vmatpush1.bf16.msra.mxu1 %v2696_v49  ;;  %v2762_v48 = vld [vmem:[%s3762_s2 + $0x2b8] ss:$16 sps:$4 sm:$0xff]   ;;  %v2767_v49 = vld [vmem:[%s3762_s2 + $0x2d4] ss:$16 sps:$4 sm:$0xff]  }
  0x46   : > { %884 = vmatprep.subr.bf16.mxu0 %v2697_v51  ;;  %982 = vmatprep.subr.bf16.mxu1 %v2699_v52  ;;  %v2770_v51 = vld [vmem:[%s3762_s2 + $0x2dc] ss:$16 sps:$4 sm:$0xff]   ;;  %v2765_v52 = vld [vmem:[%s3762_s2 + $0x2d0] ss:$16 sps:$4 sm:$0xff]  }
  0x49   : > { %885 = vmatpush1.bf16.msra.mxu0 %v2701_v53  ;;  %983 = vmatpush1.bf16.msra.mxu1 %v2702_v54  ;;  %v2768_v53 = vld [vmem:[%s3762_s2 + $0x2d8] ss:$16 sps:$4 sm:$0xff]   ;;  %v2773_v54 = vld [vmem:[%s3762_s2 + $0x2f4] ss:$16 sps:$4 sm:$0xff]  }
  0x4a   : > { %886 = vmatprep.subr.bf16.mxu0 %v2703_v55  ;;  %984 = vmatprep.subr.bf16.mxu1 %v2705_v56  ;;  %v2771_v55 = vld [vmem:[%s3762_s2 + $0x2f0] ss:$16 sps:$4 sm:$0xff]   ;;  %v2774_v56 = vld [vmem:[%s3762_s2 + $0x2f8] ss:$16 sps:$4 sm:$0xff]  }
  0x4d   : > { %887 = vmatpush1.bf16.msra.mxu0 %v2707_v57  ;;  %985 = vmatpush1.bf16.msra.mxu1 %v2708_v58  ;;  %v2779_v57 = vld [vmem:[%s3762_s2 + $0x314] ss:$16 sps:$4 sm:$0xff]   ;;  %v2782_v58 = vld [vmem:[%s3762_s2 + $0x31c] ss:$16 sps:$4 sm:$0xff]  }
  0x4e   : > { %888 = vmatprep.subr.bf16.mxu0 %v2709_v59  ;;  %986 = vmatprep.subr.bf16.mxu1 %v2711_v60  ;;  %v2777_v59 = vld [vmem:[%s3762_s2 + $0x310] ss:$16 sps:$4 sm:$0xff]   ;;  %v2780_v60 = vld [vmem:[%s3762_s2 + $0x318] ss:$16 sps:$4 sm:$0xff]  }
  0x51   : > { %889 = vmatpush1.bf16.msra.mxu0 %v2713_v0  ;;  %987 = vmatpush1.bf16.msra.mxu1 %v2714_v1  ;;  %v2783_v0 = vld [vmem:[%s3762_s2 + $0x330] ss:$16 sps:$4 sm:$0xff]   ;;  %v2786_v1 = vld [vmem:[%s3762_s2 + $0x338] ss:$16 sps:$4 sm:$0xff]  }
  0x52   : > { %890 = vmatprep.subr.bf16.mxu0 %v2715_v2  ;;  %988 = vmatprep.subr.bf16.mxu1 %v2717_v3  ;;  %v2791_v2 = vld [vmem:[%s3762_s2 + $0x354] ss:$16 sps:$4 sm:$0xff]   ;;  %v2794_v3 = vld [vmem:[%s3762_s2 + $0x35c] ss:$16 sps:$4 sm:$0xff]  }
  0x55   : > { %891 = vmatpush1.bf16.msra.mxu0 %v2719_v4  ;;  %989 = vmatpush1.bf16.msra.mxu1 %v2720_v5  ;;  %v2789_v4 = vld [vmem:[%s3762_s2 + $0x350] ss:$16 sps:$4 sm:$0xff]   ;;  %v2792_v5 = vld [vmem:[%s3762_s2 + $0x358] ss:$16 sps:$4 sm:$0xff]  }
  0x56   : > { %909 = vmatprep.subr.bf16.mxu0 %v2726_v9  ;;  %1007 = vmatprep.subr.bf16.mxu1 %v2729_v10  ;;  %v2795_v9 = vld [vmem:[%s3762_s2 + $0x370] ss:$16 sps:$4 sm:$0xff]   ;;  %v2798_v10 = vld [vmem:[%s3762_s2 + $0x378] ss:$16 sps:$4 sm:$0xff]  }
  0x58   : > { %893 = vmatmul.mubr.bf16.vlgmr.msra.gmra.mrb[0].mxu0 %v3217_v11  ;;  %991 = vmatmul.mubr.bf16.vlgmr.msra.gmra.mrb[0].mxu1 %v3217_v11 }
  0x59   : > { %910 = vmatpush1.bf16.msra.mxu0 %v2724_v12  ;;  %1008 = vmatpush1.bf16.msra.mxu1 %v2727_v15  ;;  %v2803_v12 = vld [vmem:[%s3762_s2 + $0x394] ss:$16 sps:$4 sm:$0xff]   ;;  %v2801_v15 = vld [vmem:[%s3762_s2 + $0x390] ss:$16 sps:$4 sm:$0xff]  }
  0x5a   : > { %911 = vmatprep.subr.bf16.mxu0 %v2732_v16  ;;  %1009 = vmatprep.subr.bf16.mxu1 %v2735_v17  ;;  %v2804_v16 = vld [vmem:[%s3762_s2 + $0x398] ss:$16 sps:$4 sm:$0xff]   ;;  %v2809_v17 = vld [vmem:[%s3762_s2 + $0x3b4] ss:$16 sps:$4 sm:$0xff]  }
  0x5b   : > { %902 = vmatprep.mubr.bf16.mxu0 %v3238_v19  ;;  %1000 = vmatprep.mubr.bf16.mxu1 %v3238_v19 }
  0x5d   : > { %912 = vmatpush1.bf16.msra.mxu0 %v2730_v21  ;;  %1010 = vmatpush1.bf16.msra.mxu1 %v2733_v22  ;;  %v2810_v21 = vld [vmem:[%s3762_s2 + $0x3b8] ss:$16 sps:$4 sm:$0xff]   ;;  %v2815_v22 = vld [vmem:[%s3762_s2 + $0x3d4] ss:$16 sps:$4 sm:$0xff]  }
  0x5e   : > { %2386 = vmatprep.subr.msk.bf16.mxu0 %vm847_vm1, %v2383_v23  ;;  %2389 = vmatprep.subr.msk.bf16.mxu1 %vm847_vm1, %v2385_v24  ;;  %v2818_v23 = vld [vmem:[%s3762_s2 + $0x3dc] ss:$16 sps:$4 sm:$0xff]   ;;  %v2813_v24 = vld [vmem:[%s3762_s2 + $0x3d0] ss:$16 sps:$4 sm:$0xff]  }
  0x60   : > { %903 = vmatmul.mubr.bf16.gmra.mrb[4].mxu0 %v3254_v27  ;;  %1001 = vmatmul.mubr.bf16.gmra.mrb[4].mxu1 %v3254_v27 }
  0x61   : > { %914 = vmatpush1.bf16.msra.mxu0 %v849_v28  ;;  %1012 = vmatpush1.bf16.msra.mxu1 %v855_v29  ;;  %v2824_v28 = vld [vmem:[%s3762_s2 + $0x3fc] ss:$16 sps:$4 sm:$0xff]   ;;  %v2819_v29 = vld [vmem:[%s3762_s2 + $0x3f0] ss:$16 sps:$4 sm:$0xff]  }
  0x62   : > { %941 = vmatprep.mubr.bf16.mxu0 %v2929_v32  ;;  %1039 = vmatprep.mubr.bf16.mxu1 %v2929_v32 }
  0x63   : > { %1513 = vmatprep.subr.bf16.mxu0 %v2742_v30  ;;  %1615 = vmatprep.subr.bf16.mxu1 %v2745_v31  ;;  %v2822_v30 = vld [vmem:[%s3762_s2 + $0x3f8] ss:$16 sps:$4 sm:$0xff]   ;;  %v2827_v31 = vld [vmem:[%s3762_s2 + $0x414] ss:$16 sps:$4 sm:$0xff]  }
  0x68   : > { %2387 = vmatmul.mubr.msk.bf16.vlgmr.msra.gmra.mrb[0].mxu0 %vm840_vm2, %v3277_v35  ;;  %2390 = vmatmul.mubr.msk.bf16.vlgmr.msra.gmra.mrb[0].mxu1 %vm840_vm2, %v3277_v35 }
  0x69   : > { %1514 = vmatpush1.bf16.msra.mxu0 %v2740_v33  ;;  %1616 = vmatpush1.bf16.msra.mxu1 %v2743_v34  ;;  %v2830_v33 = vld [vmem:[%s3762_s2 + $0x41c] ss:$16 sps:$4 sm:$0xff]   ;;  %v2825_v34 = vld [vmem:[%s3762_s2 + $0x410] ss:$16 sps:$4 sm:$0xff]  }
  0x6a   : > { %1515 = vmatprep.subr.bf16.mxu0 %v2749_v36  ;;  %1617 = vmatprep.subr.bf16.mxu1 %v2752_v37  ;;  %v2828_v36 = vld [vmem:[%s3762_s2 + $0x418] ss:$16 sps:$4 sm:$0xff]   ;;  %v2833_v37 = vld [vmem:[%s3762_s2 + $0x434] ss:$16 sps:$4 sm:$0xff]  }
  0x6b   : > { %951 = vmatprep.mubr.bf16.mxu0 %v2929_v32  ;;  %1049 = vmatprep.mubr.bf16.mxu1 %v2929_v32 }
  0x6d   : > { %1516 = vmatpush1.bf16.msra.mxu0 %v2747_v38  ;;  %1618 = vmatpush1.bf16.msra.mxu1 %v2750_v39  ;;  %v2836_v38 = vld [vmem:[%s3762_s2 + $0x43c] ss:$16 sps:$4 sm:$0xff]   ;;  %v2831_v39 = vld [vmem:[%s3762_s2 + $0x430] ss:$16 sps:$4 sm:$0xff]  }
  0x6e   : > { %1517 = vmatprep.subr.bf16.mxu0 %v2755_v40  ;;  %1619 = vmatprep.subr.bf16.mxu1 %v2758_v41  ;;  %v2834_v40 = vld [vmem:[%s3762_s2 + $0x438] ss:$16 sps:$4 sm:$0xff]   ;;  %v2839_v41 = vld [vmem:[%s3762_s2 + $0x454] ss:$16 sps:$4 sm:$0xff]  }
  0x70   : > { %2388 = vmatmul.mubr.msk.bf16.gmra.mrb[8].mxu0 %vm840_vm2, %v3311_v44  ;;  %2391 = vmatmul.mubr.msk.bf16.gmra.mrb[8].mxu1 %vm840_vm2, %v3311_v44 }
  0x71   : > { %1518 = vmatpush1.bf16.msra.mxu0 %v2753_v42  ;;  %1620 = vmatpush1.bf16.msra.mxu1 %v2756_v43  ;;  %v2842_v42 = vld [vmem:[%s3762_s2 + $0x45c] ss:$16 sps:$4 sm:$0xff]   ;;  %v2837_v43 = vld [vmem:[%s3762_s2 + $0x450] ss:$16 sps:$4 sm:$0xff]  }
  0x72   : > { %1519 = vmatprep.subr.bf16.mxu0 %v2761_v45  ;;  %1621 = vmatprep.subr.bf16.mxu1 %v2764_v46  ;;  %v2840_v45 = vld [vmem:[%s3762_s2 + $0x458] ss:$16 sps:$4 sm:$0xff]   ;;  %v2845_v46 = vld [vmem:[%s3762_s2 + $0x474] ss:$16 sps:$4 sm:$0xff]  }
  0x73   : > { %1545 = vmatprep.mubr.bf16.mxu0 %v3154_v50  ;;  %1647 = vmatprep.mubr.bf16.mxu1 %v3154_v50  ;;  %v2776_v50 = vld [vmem:[%s3762_s2 + $0x2fc] ss:$16 sps:$4 sm:$0xff]  }
  0x75   : > { %1520 = vmatpush1.bf16.msra.mxu0 %v2759_v47  ;;  %1622 = vmatpush1.bf16.msra.mxu1 %v2762_v48  ;;  %v2848_v47 = vld [vmem:[%s3762_s2 + $0x47c] ss:$16 sps:$4 sm:$0xff]   ;;  %v2464_v48 = vld [vmem:[%s3762_s2 + $0x490] sm:$0x11] }
  0x76   : > { %1521 = vmatprep.subr.bf16.mxu0 %v2767_v49  ;;  %1623 = vmatprep.subr.bf16.mxu1 %v2770_v51  ;;  %v2465_v49 = vld [vmem:[%s3762_s2 + $0x498] sm:$0x11]  ;;  %v2843_v51 = vld [vmem:[%s3762_s2 + $0x470] ss:$16 sps:$4 sm:$0xff]  }
  0x79   : > { %1522 = vmatpush1.bf16.msra.mxu0 %v2765_v52  ;;  %1624 = vmatpush1.bf16.msra.mxu1 %v2768_v53  ;;  %v2846_v52 = vld [vmem:[%s3762_s2 + $0x478] ss:$16 sps:$4 sm:$0xff]   ;;  %v2539_v53 = vcombine.high %v2464_v48, %v2464_v48 }
  0x7a   : > { %1523 = vmatprep.subr.bf16.mxu0 %v2773_v54  ;;  %1625 = vmatprep.subr.bf16.mxu1 %v2776_v50  ;;  %v2541_v54 = vcombine.high %v2465_v49, %v2465_v49  ;;  %v2538_v50 = vcombine.low %v2464_v48, %v2464_v48 }
  0x7d   : > { %1524 = vmatpush1.bf16.msra.mxu0 %v2771_v55  ;;  %1626 = vmatpush1.bf16.msra.mxu1 %v2774_v56  ;;  %v2540_v55 = vcombine.low %v2465_v49, %v2465_v49 }
  0x7e   : > { %1525 = vmatprep.subr.bf16.mxu0 %v2779_v57  ;;  %1627 = vmatprep.subr.bf16.mxu1 %v2782_v58 }
  0x7f   : > { %v1508_v56 = vsel %vm847_vm1, %v2540_v55, 0 }
  0x81   : > { %1526 = vmatpush1.bf16.msra.mxu0 %v2777_v59  ;;  %1628 = vmatpush1.bf16.msra.mxu1 %v2780_v60 }
  0x82   : > { %1527 = vmatprep.subr.bf16.mxu0 %v2785_v61  ;;  %1629 = vmatprep.subr.bf16.mxu1 %v2788_v62 }
  0x85   : > { %1528 = vmatpush1.bf16.msra.mxu0 %v2783_v0  ;;  %1630 = vmatpush1.bf16.msra.mxu1 %v2786_v1 }
  0x86   : > { %1529 = vmatprep.subr.bf16.mxu0 %v2791_v2  ;;  %1631 = vmatprep.subr.bf16.mxu1 %v2794_v3 }
  0x89   : > { %1530 = vmatpush1.bf16.msra.mxu0 %v2789_v4  ;;  %1632 = vmatpush1.bf16.msra.mxu1 %v2792_v5 }
  0x8a   : > { %1531 = vmatprep.subr.bf16.mxu0 %v2797_v6  ;;  %1633 = vmatprep.subr.bf16.mxu1 %v2800_v8 }
  0x8d   : > { %1532 = vmatpush1.bf16.msra.mxu0 %v2795_v9  ;;  %1634 = vmatpush1.bf16.msra.mxu1 %v2798_v10 }
  0x8e   : > { %1533 = vmatprep.subr.bf16.mxu0 %v2803_v12  ;;  %1635 = vmatprep.subr.bf16.mxu1 %v2806_v13 }
  0x91   : > { %1534 = vmatpush1.bf16.msra.mxu0 %v2801_v15  ;;  %1636 = vmatpush1.bf16.msra.mxu1 %v2804_v16 }
  0x92   : > { %1535 = vmatprep.subr.bf16.mxu0 %v2809_v17  ;;  %1637 = vmatprep.subr.bf16.mxu1 %v2812_v18 }
  0x95   : > { %1536 = vmatpush1.bf16.msra.mxu0 %v2807_v20  ;;  %1638 = vmatpush1.bf16.msra.mxu1 %v2810_v21 }
  0x96   : > { %1537 = vmatprep.subr.bf16.mxu0 %v2815_v22  ;;  %1639 = vmatprep.subr.bf16.mxu1 %v2818_v23 }
  0x99   : > { %1538 = vmatpush1.bf16.msra.mxu0 %v2813_v24  ;;  %1640 = vmatpush1.bf16.msra.mxu1 %v2816_v25 }
  0x9a   : > { %1539 = vmatprep.subr.bf16.mxu0 %v2821_v26  ;;  %1641 = vmatprep.subr.bf16.mxu1 %v2824_v28 }
  0x9d   : > { %1540 = vmatpush1.bf16.msra.mxu0 %v2819_v29  ;;  %1642 = vmatpush1.bf16.msra.mxu1 %v2822_v30 }
  0x9e   : > { %1541 = vmatprep.subr.bf16.mxu0 %v2827_v31  ;;  %1643 = vmatprep.subr.bf16.mxu1 %v2830_v33 }
  0xa1   : > { %1542 = vmatpush1.bf16.msra.mxu0 %v2825_v34  ;;  %1644 = vmatpush1.bf16.msra.mxu1 %v2828_v36 }
  0xa2   : > { %1543 = vmatprep.subr.bf16.mxu0 %v2833_v37  ;;  %1645 = vmatprep.subr.bf16.mxu1 %v2836_v38 }
  0xa5   : > { %1544 = vmatpush1.bf16.msra.mxu0 %v2831_v39  ;;  %1646 = vmatpush1.bf16.msra.mxu1 %v2834_v40 }
  0xa6   : > { %1564 = vmatprep.subr.bf16.mxu0 %v2839_v41  ;;  %1666 = vmatprep.subr.bf16.mxu1 %v2842_v42 }
  0xa8   : > { %1546 = vmatmul.mubr.bf16.vlgmr.msra.gmra.mrb[12].mxu0 %v3217_v11  ;;  %1648 = vmatmul.mubr.bf16.vlgmr.msra.gmra.mrb[12].mxu1 %v3217_v11  ;;  %v1502_v11 = vsel %vm847_vm1, %v2538_v50, 0 }
  0xa9   : > { %1565 = vmatpush1.bf16.msra.mxu0 %v2837_v43  ;;  %1667 = vmatpush1.bf16.msra.mxu1 %v2840_v45 }
  0xaa   : > { %1566 = vmatprep.subr.bf16.mxu0 %v2845_v46  ;;  %1668 = vmatprep.subr.bf16.mxu1 %v2848_v47 }
  0xab   : > { %1555 = vmatprep.mubr.bf16.mxu0 %v3238_v19  ;;  %1657 = vmatprep.mubr.bf16.mxu1 %v3238_v19 }
  0xad   : > { %1567 = vmatpush1.bf16.msra.mxu0 %v2843_v51  ;;  %1669 = vmatpush1.bf16.msra.mxu1 %v2846_v52 }
  0xae   : > { %2542 = vmatprep.subr.msk.bf16.mxu0 %vm847_vm1, %v2539_v53  ;;  %2545 = vmatprep.subr.msk.bf16.mxu1 %vm847_vm1, %v2541_v54 }
  0xb0   : > { %1556 = vmatmul.mubr.bf16.gmra.mrb[16].mxu0 %v3254_v27  ;;  %1658 = vmatmul.mubr.bf16.gmra.mrb[16].mxu1 %v3254_v27 }
  0xb1   : > { %1569 = vmatpush1.bf16.msra.mxu0 %v1502_v11  ;;  %1671 = vmatpush1.bf16.msra.mxu1 %v1508_v56 }
  0xb2   : > { %1596 = vmatprep.mubr.bf16.mxu0 %v2929_v32  ;;  %1698 = vmatprep.mubr.bf16.mxu1 %v2929_v32 }
  0xb8   : > { %2543 = vmatmul.mubr.msk.bf16.vlgmr.msra.gmra.mrb[12].mxu0 %vm840_vm2, %v3277_v35  ;;  %2546 = vmatmul.mubr.msk.bf16.vlgmr.msra.gmra.mrb[12].mxu1 %vm840_vm2, %v3277_v35 }
  0xb9   : > { %1606 = vmatprep.mubr.bf16.mxu0 %v2929_v32  ;;  %1708 = vmatprep.mubr.bf16.mxu1 %v2929_v32 }
  0xc0   : > { %2544 = vmatmul.mubr.msk.bf16.gmra.mrb[16].mxu0 %vm840_vm2, %v3311_v44  ;;  %2547 = vmatmul.mubr.msk.bf16.gmra.mrb[16].mxu1 %vm840_vm2, %v3311_v44 }
 0x133   : > { %v904_v19 = vpop.f32.mrb[4].mxu0  ;;  %v1002_v27 = vpop.f32.mrb[4].mxu1 }
 0x134   : > { %v905_v57 = vpop.f32.mrb[5].mxu0  ;;  %v1003_v58 = vpop.f32.mrb[5].mxu1 }
 0x135   : > { %v906_v59 = vpop.f32.mrb[6].mxu0  ;;  %v1004_v60 = vpop.f32.mrb[6].mxu1 }
 0x136   : > { %v907_v61 = vpop.f32.mrb[7].mxu0  ;;  %v1005_v62 = vpop.f32.mrb[7].mxu1 }
 0x137   : > { %v1772_v62 = vadd.s32 (!%p2548_p7), 8, %v3207_v7 }
 0x139   : > { %vm1777_vm4 = vcmp.lt.s32.totalorder (!%p2548_p7), %v1772_v62, 11 }
 0x13b   : > { %v943_v0 = vpop.f32.mrb[0].mxu0  ;;  %v1041_v35 = vpop.f32.mrb[0].mxu1 }
 0x13c   : > { %v945_v1 = vpop.f32.mrb[1].mxu0  ;;  %v1043_v2 = vpop.f32.mrb[1].mxu1 }
 0x13d   : > { %v947_v3 = vpop.f32.mrb[2].mxu0  ;;  %v1045_v32 = vpop.f32.mrb[2].mxu1 }
 0x13e   : > { %v949_v4 = vpop.f32.mrb[3].mxu0  ;;  %v1047_v5 = vpop.f32.mrb[3].mxu1 }
 0x143   : > { %v953_v6 = vpop.f32.mrb[8].mxu0  ;;  %v1051_v8 = vpop.f32.mrb[8].mxu1 }
 0x144   : > { %v954_v9 = vpop.f32.mrb[9].mxu0  ;;  %v1052_v44 = vpop.f32.mrb[9].mxu1 }
 0x145   : > { %v955_v10 = vpop.f32.mrb[10].mxu0  ;;  %v1053_v12 = vpop.f32.mrb[10].mxu1 }
 0x146   : > { %v956_v13 = vpop.f32.mrb[11].mxu0  ;;  %v1054_v15 = vpop.f32.mrb[11].mxu1 }
 0x18b   : > { %v1598_v16 = vpop.f32.mrb[12].mxu0  ;;  %v1700_v17 = vpop.f32.mrb[12].mxu1 }
 0x18c   : > { %v1600_v18 = vpop.f32.mrb[13].mxu0  ;;  %v1702_v20 = vpop.f32.mrb[13].mxu1  ;;  %v1730_v23 = vrot.slane %v1598_v16, 1  ;;  %v1736_v24 = vrot.slane %v1700_v17, 1 }
 0x18d   : > { %v1602_v21 = vpop.f32.mrb[14].mxu0  ;;  %v1704_v22 = vpop.f32.mrb[14].mxu1  ;;  %v1733_v30 = vrot.slane %v1600_v18, 1  ;;  %v1739_v31 = vrot.slane %v1702_v20, 1 }
 0x18e   : > { %v1731_v25 = vrot.slane %v1602_v21, 1  ;;  %v1737_v26 = vrot.slane %v1704_v22, 1  ;;  %v1604_v28 = vpop.f32.mrb[15].mxu0  ;;  %v1706_v29 = vpop.f32.mrb[15].mxu1 }
 0x18f   : > { %v1734_v33 = vrot.slane %v1604_v28, 1  ;;  %v1740_v34 = vrot.slane %v1706_v29, 1 }
 0x190   : > { %v1732_v36 = vsel %vm1729_vm3, %v1730_v23, %v1731_v25  ;;  %v1738_v37 = vsel %vm1729_vm3, %v1736_v24, %v1737_v26 }
 0x191   : > { %v3529_v38 = vadd.f32 %v1732_v36, %v943_v0  ;;  %v3531_v39 = vadd.f32 %v1738_v37, %v1041_v35  ;;  %v1735_v40 = vsel %vm1729_vm3, %v1733_v30, %v1734_v33  ;;  %v1741_v41 = vsel %vm1729_vm3, %v1739_v31, %v1740_v34 }
 0x192   : > { %v3535_v42 = vadd.f32 %v1735_v40, %v945_v1  ;;  %v3537_v43 = vadd.f32 %v1741_v41, %v1043_v2  ;;  %1768 = sbr.rel (%p2548_p7) target bundleno = 439 (0x1b7), region = 48  ;;  %v2930_v0 = vmov (!%p2548_p7), 0.0  }
 0x193   : > { %v1608_v45 = vpop.f32.mrb[16].mxu0  ;;  %v1710_v46 = vpop.f32.mrb[16].mxu1  ;;  %v2549_v35 = vsel (!%p2548_p7), %vm1777_vm4, 1.0, %v2930_v0  ;;  %v1857_v6 = vmul.f32 (!%p2548_p7), %v3531_v39, %v3531_v39 }
 0x194   : > { %v1742_v47 = vrot.slane %v1608_v45, 1  ;;  %v1746_v48 = vrot.slane %v1710_v46, 1  ;;  %v1610_v49 = vpop.f32.mrb[17].mxu0  ;;  %v1712_v51 = vpop.f32.mrb[17].mxu1  ;;  %v1858_v8 = vmul.f32 (!%p2548_p7), %v3537_v43, %v3537_v43 }
 0x195   : > { %v1744_v52 = vrot.slane %v1610_v49, 1  ;;  %v1748_v53 = vrot.slane %v1712_v51, 1  ;;  %v1612_v54 = vpop.f32.mrb[18].mxu0  ;;  %v1714_v50 = vpop.f32.mrb[18].mxu1 }
 0x196   : > { %v1743_v55 = vsel %vm1729_vm3, %v1731_v25, %v1742_v47  ;;  %v1747_v11 = vsel %vm1729_vm3, %v1737_v26, %v1746_v48  ;;  %v1613_v56 = vpop.f32.mrb[19].mxu0  ;;  %v1715_v19 = vpop.f32.mrb[19].mxu1 }
 0x197   : > { %v3541_v27 = vadd.f32 %v1743_v55, %v947_v3  ;;  %v3543_v57 = vadd.f32 %v1747_v11, %v1045_v32  ;;  %v1745_v58 = vsel %vm1729_vm3, %v1734_v33, %v1744_v52  ;;  %v1749_v59 = vsel %vm1729_vm3, %v1740_v34, %v1748_v53 }
 0x198   : > { %v3547_v60 = vadd.f32 %v1745_v58, %v949_v4  ;;  %v3549_v61 = vadd.f32 %v1749_v59, %v1047_v5  ;;  %v1855_v4 = vmul.f32 (!%p2548_p7), %v3529_v38, %v3529_v38  ;;  %v1856_v5 = vmul.f32 (!%p2548_p7), %v3535_v42, %v3535_v42 }
 0x199   : > { %v1786_v1 = vmul.f32 %v2549_v35, %v3541_v27  ;;  %v1788_v3 = vmul.f32 %v2549_v35, %v3543_v57 }
 0x19a   : > { %v1787_v2 = vmul.f32 %v2549_v35, %v3547_v60  ;;  %v1789_v32 = vmul.f32 %v2549_v35, %v3549_v61 }
 0x19b   : > { %v1791_v9 = vadd.f32 %v1786_v1, %v3529_v38  ;;  %v1805_v10 = vadd.f32 %v1788_v3, %v3531_v39  ;;  %v1859_v13 = vmul.f32 %v1786_v1, %v1786_v1  ;;  %v1861_v16 = vmul.f32 %v1788_v3, %v1788_v3 }
 0x19c   : > { %v1798_v44 = vadd.f32 %v1787_v2, %v3535_v42  ;;  %v1812_v12 = vadd.f32 %v1789_v32, %v3537_v43  ;;  %v1860_v15 = vmul.f32 %v1787_v2, %v1787_v2  ;;  %v1862_v17 = vmul.f32 %v1789_v32, %v1789_v32 }
 0x19d   : > { %v1792_v18 = vrot.slane %v1791_v9, 4  ;;  %v1806_v21 = vrot.slane %v1805_v10, 4  ;;  %v1863_v23 = vadd.f32 %v1859_v13, %v1855_v4  ;;  %v1877_v25 = vadd.f32 %v1861_v16, %v1857_v6 }
 0x19e   : > { %v1799_v20 = vrot.slane %v1798_v44, 4  ;;  %v1813_v22 = vrot.slane %v1812_v12, 4  ;;  %v1870_v24 = vadd.f32 %v1860_v15, %v1856_v5  ;;  %v1884_v26 = vadd.f32 %v1862_v17, %v1858_v8 }
 0x19f   : > { %v1793_v28 = vadd.f32 %v1792_v18, %v1791_v9  ;;  %v1807_v30 = vadd.f32 %v1806_v21, %v1805_v10  ;;  %v1864_v33 = vrot.slane %v1863_v23, 4  ;;  %v1878_v36 = vrot.slane %v1877_v25, 4 }
 0x1a0   : > { %v1800_v29 = vadd.f32 %v1799_v20, %v1798_v44  ;;  %v1814_v31 = vadd.f32 %v1813_v22, %v1812_v12  ;;  %v1871_v34 = vrot.slane %v1870_v24, 4  ;;  %v1885_v37 = vrot.slane %v1884_v26, 4 }
 0x1a1   : > { %v1794_v40 = vrot.slane %v1793_v28, 2  ;;  %v1808_v45 = vrot.slane %v1807_v30, 2  ;;  %v1865_v47 = vadd.f32 %v1864_v33, %v1863_v23  ;;  %v1879_v49 = vadd.f32 %v1878_v36, %v1877_v25  ;;  %v1790_v25 = vld [vmem:[#allocation2] sm:$0xf]  ;;  %v1854_v33 = vld [vmem:[#allocation3] sm:$0xf] }
 0x1a2   : > { %v1801_v41 = vrot.slane %v1800_v29, 2  ;;  %v1815_v46 = vrot.slane %v1814_v31, 2  ;;  %v1872_v48 = vadd.f32 %v1871_v34, %v1870_v24  ;;  %v1886_v51 = vadd.f32 %v1885_v37, %v1884_v26 }
 0x1a3   : > { %v1795_v52 = vadd.f32 %v1794_v40, %v1793_v28  ;;  %v1809_v54 = vadd.f32 %v1808_v45, %v1807_v30  ;;  %v1866_v55 = vrot.slane %v1865_v47, 2  ;;  %v1880_v56 = vrot.slane %v1879_v49, 2 }
 0x1a4   : > { %v1802_v53 = vadd.f32 %v1801_v41, %v1800_v29  ;;  %v1816_v50 = vadd.f32 %v1815_v46, %v1814_v31  ;;  %v1873_v11 = vrot.slane %v1872_v48, 2  ;;  %v1887_v19 = vrot.slane %v1886_v51, 2 }
 0x1a5   : > { %v1796_v58 = vrot.slane %v1795_v52, 1  ;;  %v1810_v62 = vrot.slane %v1809_v54, 1  ;;  %v1867_v35 = vadd.f32 %v1866_v55, %v1865_v47  ;;  %v1881_v2 = vadd.f32 %v1880_v56, %v1879_v49 }
 0x1a6   : > { %v1803_v59 = vrot.slane %v1802_v53, 1  ;;  %v1817_v0 = vrot.slane %v1816_v50, 1  ;;  %v1874_v1 = vadd.f32 %v1873_v11, %v1872_v48  ;;  %v1888_v3 = vadd.f32 %v1887_v19, %v1886_v51 }
 0x1a7   : > { %v1797_v32 = vadd.f32 %v1796_v58, %v1795_v52  ;;  %v1811_v5 = vadd.f32 %v1810_v62, %v1809_v54  ;;  %v1868_v8 = vrot.slane %v1867_v35, 1  ;;  %v1882_v44 = vrot.slane %v1881_v2, 1 }
 0x1a8   : > { %v1804_v4 = vadd.f32 %v1803_v59, %v1802_v53  ;;  %v1818_v6 = vadd.f32 %v1817_v0, %v1816_v50  ;;  %v1875_v9 = vrot.slane %v1874_v1, 1  ;;  %v1889_v10 = vrot.slane %v1888_v3, 1 }
 0x1a9   : > { %v1869_v15 = vadd.f32 %v1868_v8, %v1867_v35  ;;  %v1883_v17 = vadd.f32 %v1882_v44, %v1881_v2 }
 0x1aa   : > { %v1823_v12 = vcombine.low %v1797_v32, %v1804_v4  ;;  %v1824_v13 = vcombine.low %v1811_v5, %v1818_v6  ;;  %v1876_v16 = vadd.f32 %v1875_v9, %v1874_v1  ;;  %v1890_v18 = vadd.f32 %v1889_v10, %v1888_v3 }
 0x1ac   : > { %v1831_v20 = vrot.slane %v1823_v12, %v3223_v14  ;;  %v1838_v21 = vrot.slane %v1824_v13, %v3223_v14  ;;  %v1895_v22 = vcombine.low %v1869_v15, %v1876_v16  ;;  %v1896_v23 = vcombine.low %v1883_v17, %v1890_v18 }
 0x1ae   : > { %v1839_v24 = vcombine.low %v1831_v20, %v1838_v21  ;;  %v1903_v26 = vrot.slane %v1895_v22, %v3223_v14  ;;  %v1910_v28 = vrot.slane %v1896_v23, %v3223_v14 }
 0x1b0   : > { %v1846_v29 = vrot.slane %v1839_v24, %v3223_v14  ;;  %v1911_v30 = vcombine.low %v1903_v26, %v1910_v28 }
 0x1b2   : > { %v1848_v31 = vadd.f32 %v1846_v29, %v1790_v25  ;;  %v1918_v34 = vrot.slane %v1911_v30, %v3223_v14 }
 0x1b4   : > { %1853 = vst.msk [vmem:[#allocation2] sm:$0xf] %vm1851_vm5, %v1848_v31  ;;  %v1920_v36 = vadd.f32 %v1918_v34, %v1854_v33 }
 0x1b6   : > { %1921 = vst.msk [vmem:[#allocation3] sm:$0xf] %vm1851_vm5, %v1920_v36 }
 0x1b7 PF: > { %p2550_p8 = scmp.ne.s32.totalorder %s2909_s18, 1 }
 0x1b8   : > { %v1933_v14 = vld [vmem:[%s3763_s3] sm:$0xf] (!%p2550_p8)  ;;  %v1943_v49 = vsub.s32 (!%p2550_p8), 0, %v3207_v7  ;;  %v1947_v51 = vsub.s32 (!%p2550_p8), 1, %v3207_v7  ;;  %v1951_v52 = vsub.s32 (!%p2550_p8), 2, %v3207_v7  ;;  %v1955_v54 = vsub.s32 (!%p2550_p8), 3, %v3207_v7 }
 0x1b9   : > { %1925 = sbr.rel (%p2550_p8) target bundleno = 529 (0x211), region = 52  ;;  %v1937_v55 = vld [vmem:[%s3764_s4] sm:$0xf] (!%p2550_p8) }
 0x1bb   : > { %v1926_v37 = vld [vmem:[#allocation2] sm:$0xf] (!%p2550_p8) }
 0x1bc   : > { %v1927_v41 = vmul.f32 (!%p2550_p8), 0.09090909, %v1926_v37 }
 0x1bd   : > { %v1928_v40 = vld [vmem:[#allocation3] sm:$0xf] (!%p2550_p8) }
 0x1be   : > { %v1929_v45 = vmul.f32 (!%p2550_p8), 0.09090909, %v1928_v40  ;;  %v1930_v46 = vmul.f32 (!%p2550_p8), %v1927_v41, %v1927_v41 }
 0x1c0   : > { %v1931_v47 = vsub.f32 %v1929_v45, %v1930_v46 }
 0x1c2   : > { %v1932_v48 = vmax.f32 %v1931_v47, 0.0 }
 0x1c4   : > { %v1934_v63 = vadd.f32 1e-05, %v1932_v48 }
 0x1c6   : > { %2853 = vrsqrt.f32 %v1934_v63 }
 0x1d0   : > { %v2854_v53 = vpop.eup %2853 }
 0x1d1   : > { %v1936_v50 = vmul.f32 %v2854_v53, %v1933_v14 }
 0x1d3   : > { %v1938_v11 = vmul.f32 %v1936_v50, %v1927_v41  ;;  %v1944_v56 = vrot.slane %v1936_v50, %v1943_v49  ;;  %v1948_v19 = vrot.slane %v1936_v50, %v1947_v51  ;;  %v1952_v58 = vrot.slane %v1936_v50, %v1951_v52 }
 0x1d4   : > { %v1956_v59 = vrot.slane %v1936_v50, %v1955_v54 }
 0x1d5   : > { %v1939_v62 = vsub.f32 %v1937_v55, %v1938_v11  ;;  %v1961_v0 = vmul.f32 %v1944_v56, %v3529_v38  ;;  %v1962_v35 = vmul.f32 %v1948_v19, %v3535_v42  ;;  %v1963_v1 = vmul.f32 %v1952_v58, %v3531_v39 }
 0x1d6   : > { %v1964_v2 = vmul.f32 %v1956_v59, %v3537_v43  ;;  %v1965_v9 = vmul.f32 %v1944_v56, %v3541_v27  ;;  %v1966_v42 = vmul.f32 %v1948_v19, %v3547_v60  ;;  %v1967_v27 = vmul.f32 %v1952_v58, %v3543_v57 }
 0x1d7   : > { %v1973_v7 = vrot.slane %v1939_v62, %v1943_v49  ;;  %v1977_v3 = vrot.slane %v1939_v62, %v1947_v51  ;;  %v1981_v32 = vrot.slane %v1939_v62, %v1951_v52  ;;  %v1985_v4 = vrot.slane %v1939_v62, %v1955_v54 }
 0x1d8   : > { %v1968_v22 = vmul.f32 %v1956_v59, %v3549_v61 }
 0x1d9   : > { %v3591_v5 = vadd.f32 %v1973_v7, %v1961_v0  ;;  %v3593_v6 = vadd.f32 %v1977_v3, %v1962_v35  ;;  %v3595_v8 = vadd.f32 %v1981_v32, %v1963_v1  ;;  %v3598_v44 = vadd.f32 %v1985_v4, %v1964_v2 }
 0x1da   : > { %v3608_v13 = vadd.f32 %v1973_v7, %v1965_v9  ;;  %v3614_v60 = vadd.f32 %v1977_v3, %v1966_v42  ;;  %v3621_v24 = vadd.f32 %v1981_v32, %v1967_v27  ;;  %v3630_v33 = vadd.f32 %v1985_v4, %v1968_v22 }
 0x1db   : > { %v1998_v38 = vand.u32 2147483647, %v3591_v5  ;;  %v1999_v39 = vand.u32 2147483647, %v3593_v6  ;;  %v2000_v43 = vand.u32 2147483647, %v3595_v8 }
 0x1dc   : > { %v2001_v16 = vand.u32 2147483647, %v3598_v44  ;;  %v2118_v20 = vmul.f32 -0.5, %v3591_v5  ;;  %v2002_v57 = vand.u32 2147483647, %v3608_v13  ;;  %v2119_v25 = vmul.f32 -0.5, %v3593_v6 }
 0x1dd   : > { %v2006_v10 = vmul.f32 0.23164189, %v1998_v38  ;;  %v2007_v12 = vmul.f32 0.23164189, %v1999_v39  ;;  %v2008_v15 = vmul.f32 0.23164189, %v2000_v43 }
 0x1de   : > { %v2009_v21 = vmul.f32 0.23164189, %v2001_v16  ;;  %v2010_v28 = vmul.f32 0.23164189, %v2002_v57  ;;  %v2003_v29 = vand.u32 2147483647, %v3614_v60  ;;  %v2126_v30 = vmul.f32 %v2118_v20, %v3591_v5 }
 0x1df   : > { %v2014_v17 = vadd.f32 1.0, %v2006_v10  ;;  %v2015_v18 = vadd.f32 1.0, %v2007_v12  ;;  %v2016_v23 = vadd.f32 1.0, %v2008_v15  ;;  %v2120_v31 = vmul.f32 -0.5, %v3595_v8 }
 0x1e0   : > { %v2017_v26 = vadd.f32 1.0, %v2009_v21  ;;  %v2121_v61 = vmul.f32 -0.5, %v3598_v44  ;;  %v2018_v34 = vadd.f32 1.0, %v2010_v28  ;;  %v2011_v36 = vmul.f32 0.23164189, %v2003_v29 }
 0x1e1   : > { %2855 = vrcp.f32 %v2014_v17  ;;  %v2004_v37 = vand.u32 2147483647, %v3621_v24  ;;  %v2127_v40 = vmul.f32 %v2119_v25, %v3593_v6  ;;  %v2122_v41 = vmul.f32 -0.5, %v3608_v13 }
 0x1e2   : > { %2857 = vrcp.f32 %v2015_v18  ;;  %v2019_v45 = vadd.f32 1.0, %v2011_v36  ;;  %v2134_v47 = vmul.f32 1.442695, %v2126_v30  ;;  %v2128_v48 = vmul.f32 %v2120_v31, %v3595_v8 }
 0x1e3   : > { %2859 = vrcp.f32 %v2016_v23  ;;  %v2012_v46 = vmul.f32 0.23164189, %v2004_v37  ;;  %v2005_v63 = vand.u32 2147483647, %v3630_v33  ;;  %v2129_v14 = vmul.f32 %v2121_v61, %v3598_v44 }
 0x1e4   : > { %2861 = vrcp.f32 %v2017_v26  ;;  %v2123_v49 = vmul.f32 -0.5, %v3614_v60  ;;  %v2136_v52 = vmul.f32 1.442695, %v2127_v40  ;;  %v2130_v50 = vmul.f32 %v2122_v41, %v3608_v13 }
 0x1e5   : > { %2863 = vrcp.f32 %v2018_v34  ;;  %v2020_v51 = vadd.f32 1.0, %v2012_v46  ;;  %v2013_v53 = vmul.f32 0.23164189, %v2005_v63  ;;  %v2124_v55 = vmul.f32 -0.5, %v3621_v24 }
 0x1e6   : > { %2865 = vrcp.f32 %v2019_v45  ;;  %v2138_v56 = vmul.f32 1.442695, %v2128_v48  ;;  %v2140_v59 = vmul.f32 1.442695, %v2129_v14  ;;  %v2131_v62 = vmul.f32 %v2123_v49, %v3614_v60 }
 0x1e7   : > { %2867 = vpow2.f32 %v2134_v47  ;;  %v2021_v19 = vadd.f32 1.0, %v2013_v53  ;;  %v2125_v0 = vmul.f32 -0.5, %v3630_v33  ;;  %v2142_v7 = vmul.f32 1.442695, %v2130_v50 }
 0x1e8   : > { %2869 = vrcp.f32 %v2020_v51  ;;  %v2132_v3 = vmul.f32 %v2124_v55, %v3621_v24  ;;  %v2144_v10 = vmul.f32 1.442695, %v2131_v62  ;;  %v2102_v21 = vmax.f32 %v3591_v5, 0.0 }
 0x1e9   : > { %2871 = vpow2.f32 %v2136_v52  ;;  %v2133_v12 = vmul.f32 %v2125_v0, %v3630_v33  ;;  %v2103_v31 = vmax.f32 %v3593_v6, 0.0  ;;  %v2104_v48 = vmax.f32 %v3595_v8, 0.0 }
 0x1ea   : > { %2873 = vrcp.f32 %v2021_v19  ;;  %v2146_v22 = vmul.f32 1.442695, %v2132_v3 }
 0x1eb   : > { %v3645_v54 = vpop.eup %2855  ;;  %2875 = vpow2.f32 %v2138_v56  ;;  %v2148_v34 = vmul.f32 1.442695, %v2133_v12 }
 0x1ec   : > { %v2030_v11 = vmul.f32 0.5307027, %v3645_v54  ;;  %v3650_v58 = vpop.eup %2857  ;;  %2877 = vpow2.f32 %v2140_v59 }
 0x1ed   : > { %v2031_v1 = vmul.f32 0.5307027, %v3650_v58  ;;  %v3655_v2 = vpop.eup %2859  ;;  %2879 = vpow2.f32 %v2142_v7 }
 0x1ee   : > { %v2038_v35 = vadd.f32 -0.72657603, %v2030_v11  ;;  %v2032_v9 = vmul.f32 0.5307027, %v3655_v2  ;;  %v3660_v42 = vpop.eup %2861  ;;  %2881 = vpow2.f32 %v2144_v10 }
 0x1ef   : > { %v2039_v4 = vadd.f32 -0.72657603, %v2031_v1  ;;  %v2033_v18 = vmul.f32 0.5307027, %v3660_v42  ;;  %v3665_v20 = vpop.eup %2863  ;;  %2883 = vpow2.f32 %v2146_v22 }
 0x1f0   : > { %v2046_v32 = vmul.f32 %v3645_v54, %v2038_v35  ;;  %v2040_v17 = vadd.f32 -0.72657603, %v2032_v9  ;;  %v3670_v30 = vpop.eup %2865  ;;  %v2034_v61 = vmul.f32 0.5307027, %v3665_v20  ;;  %2885 = vpow2.f32 %v2148_v34 }
 0x1f1   : > { %v2047_v15 = vmul.f32 %v3650_v58, %v2039_v4  ;;  %v2041_v28 = vadd.f32 -0.72657603, %v2033_v18  ;;  %v2868_v36 = vpop.eup %2867  ;;  %v2035_v49 = vmul.f32 0.5307027, %v3670_v30 }
 0x1f2   : > { %v2054_v27 = vadd.f32 0.7107069, %v2046_v32  ;;  %v2048_v26 = vmul.f32 %v3655_v2, %v2040_v17  ;;  %v3676_v47 = vpop.eup %2869  ;;  %v2042_v14 = vadd.f32 -0.72657603, %v2034_v61 }
 0x1f3   : > { %v2055_v25 = vadd.f32 0.7107069, %v2047_v15  ;;  %v2049_v46 = vmul.f32 %v3660_v42, %v2041_v28  ;;  %v2872_v51 = vpop.eup %2871  ;;  %v2043_v19 = vadd.f32 -0.72657603, %v2035_v49  ;;  %v2036_v59 = vmul.f32 0.5307027, %v3676_v47 }
 0x1f4   : > { %v2062_v23 = vmul.f32 %v3645_v54, %v2054_v27  ;;  %v2056_v45 = vadd.f32 0.7107069, %v2048_v26  ;;  %v3682_v11 = vpop.eup %2873  ;;  %v2050_v56 = vmul.f32 %v3665_v20, %v2042_v14 }
 0x1f5   : > { %v2063_v41 = vmul.f32 %v3650_v58, %v2055_v25  ;;  %v2057_v55 = vadd.f32 0.7107069, %v2049_v46  ;;  %v2876_v62 = vpop.eup %2875  ;;  %v2051_v4 = vmul.f32 %v3670_v30, %v2043_v19  ;;  %v2044_v9 = vadd.f32 -0.72657603, %v2036_v59 }
 0x1f6   : > { %v2070_v40 = vadd.f32 -0.14224836, %v2062_v23  ;;  %v2064_v50 = vmul.f32 %v3655_v2, %v2056_v45  ;;  %v2878_v3 = vpop.eup %2877  ;;  %v2058_v32 = vadd.f32 0.7107069, %v2050_v56  ;;  %v2037_v10 = vmul.f32 0.5307027, %v3682_v11 }
 0x1f7   : > { %v2071_v53 = vadd.f32 -0.14224836, %v2063_v41  ;;  %v2065_v7 = vmul.f32 %v3660_v42, %v2057_v55  ;;  %v2880_v18 = vpop.eup %2879  ;;  %v2059_v23 = vadd.f32 0.7107069, %v2051_v4  ;;  %v2052_v25 = vmul.f32 %v3676_v47, %v2044_v9 }
 0x1f8   : > { %v2078_v52 = vmul.f32 %v3645_v54, %v2070_v40  ;;  %v2072_v1 = vadd.f32 -0.14224836, %v2064_v50  ;;  %v2066_v22 = vmul.f32 %v3665_v20, %v2058_v32  ;;  %v2045_v26 = vadd.f32 -0.72657603, %v2037_v10 }
 0x1f9   : > { %v2079_v35 = vmul.f32 %v3650_v58, %v2071_v53  ;;  %v2073_v17 = vadd.f32 -0.14224836, %v2065_v7  ;;  %v2067_v45 = vmul.f32 %v3670_v30, %v2059_v23  ;;  %v2060_v46 = vadd.f32 0.7107069, %v2052_v25 }
 0x1fa   : > { %v2086_v0 = vadd.f32 0.1274148, %v2078_v52  ;;  %v2080_v15 = vmul.f32 %v3655_v2, %v2072_v1  ;;  %v2074_v41 = vadd.f32 -0.14224836, %v2066_v22  ;;  %v2053_v14 = vmul.f32 %v3682_v11, %v2045_v26 }
 0x1fb   : > { %v2087_v27 = vadd.f32 0.1274148, %v2079_v35  ;;  %v2081_v40 = vmul.f32 %v3660_v42, %v2073_v17  ;;  %v2075_v55 = vadd.f32 -0.14224836, %v2067_v45  ;;  %v2068_v56 = vmul.f32 %v3676_v47, %v2060_v46 }
 0x1fc   : > { %v2094_v12 = vmul.f32 %v3645_v54, %v2086_v0  ;;  %v2088_v34 = vadd.f32 0.1274148, %v2080_v15  ;;  %v2882_v54 = vpop.eup %2881  ;;  %v2061_v19 = vadd.f32 0.7107069, %v2053_v14  ;;  %v2107_v15 = vmax.f32 %v3614_v60, 0.0 }
 0x1fd   : > { %v2095_v61 = vmul.f32 %v3650_v58, %v2087_v27  ;;  %v2884_v50 = vpop.eup %2883  ;;  %v2082_v58 = vmul.f32 %v3665_v20, %v2074_v41  ;;  %v2083_v1 = vmul.f32 %v3670_v30, %v2075_v55  ;;  %v2076_v7 = vadd.f32 -0.14224836, %v2068_v56 }
 0x1fe   : > { %v2110_v28 = vmul.f32 %v2094_v12, %v1998_v38  ;;  %v2096_v53 = vmul.f32 %v3655_v2, %v2088_v34  ;;  %v2089_v38 = vadd.f32 0.1274148, %v2081_v40  ;;  %v2886_v2 = vpop.eup %2885  ;;  %v2069_v32 = vmul.f32 %v3682_v11, %v2061_v19 }
 0x1ff   : > { %v2111_v52 = vmul.f32 %v2095_v61, %v1999_v39  ;;  %v2090_v35 = vadd.f32 0.1274148, %v2082_v58  ;;  %v2084_v9 = vmul.f32 %v3676_v47, %v2076_v7  ;;  %v2109_v60 = vmax.f32 %v3630_v33, 0.0 }
 0x200   : > { %v2150_v49 = vmul.f32 %v2868_v36, %v2110_v28  ;;  %v2112_v36 = vmul.f32 %v2096_v53, %v2000_v43  ;;  %v2097_v39 = vmul.f32 %v3660_v42, %v2089_v38  ;;  %v2077_v10 = vadd.f32 -0.14224836, %v2069_v32 }
 0x201   : > { %v2151_v0 = vmul.f32 %v2872_v51, %v2111_v52  ;;  %v2098_v42 = vmul.f32 %v3665_v20, %v2090_v35  ;;  %v2091_v51 = vadd.f32 0.1274148, %v2083_v1 }
 0x202   : > { %v2158_v59 = vsub.f32 %v2102_v21, %v2150_v49  ;;  %v2152_v5 = vmul.f32 %v2876_v62, %v2112_v36  ;;  %v2105_v21 = vmax.f32 %v3598_v44, 0.0  ;;  %v2113_v43 = vmul.f32 %v2097_v39, %v2001_v16 }
 0x203   : > { %v2159_v4 = vsub.f32 %v2103_v31, %v2151_v0  ;;  %v2106_v31 = vmax.f32 %v3608_v13, 0.0  ;;  %v2114_v62 = vmul.f32 %v2098_v42, %v2002_v57  ;;  %v2099_v44 = vmul.f32 %v3670_v30, %v2091_v51 }
 0x204   : > { %2166 = vst [vmem:[%s2997_s30] sm:$0xff] %v2158_v59  ;;  %v2160_v12 = vsub.f32 %v2104_v48, %v2152_v5  ;;  %v2153_v6 = vmul.f32 %v2878_v3, %v2113_v43  ;;  %v2092_v16 = vadd.f32 0.1274148, %v2084_v9  ;;  %v2085_v20 = vmul.f32 %v3682_v11, %v2077_v10 }
 0x205   : > { %2167 = vst [vmem:[%s2997_s30 + $0x8] sm:$0xff] %v2159_v4  ;;  %v2154_v17 = vmul.f32 %v2880_v18, %v2114_v62  ;;  %v2115_v8 = vmul.f32 %v2099_v44, %v2003_v29  ;;  %v2108_v57 = vmax.f32 %v3621_v24, 0.0 }
 0x206   : > { %2168 = vst [vmem:[%s2997_s30 + $0x10] sm:$0xff] %v2160_v12  ;;  %v2161_v27 = vsub.f32 %v2105_v21, %v2153_v6  ;;  %v2100_v48 = vmul.f32 %v3676_v47, %v2092_v16  ;;  %v2093_v13 = vadd.f32 0.1274148, %v2085_v20 }
 0x207   : > { %v2162_v30 = vsub.f32 %v2106_v31, %v2154_v17  ;;  %v2155_v3 = vmul.f32 %v2882_v54, %v2115_v8 }
 0x208   : > { %2169 = vst [vmem:[%s2997_s30 + $0x18] sm:$0xff] %v2161_v27  ;;  %v2116_v22 = vmul.f32 %v2100_v48, %v2004_v37  ;;  %v2101_v23 = vmul.f32 %v3682_v11, %v2093_v13 }
 0x209   : > { %2170 = vst [vmem:[%s2997_s30 + $0x20] sm:$0xff] %v2162_v30  ;;  %v2163_v18 = vsub.f32 %v2107_v15, %v2155_v3 }
 0x20a   : > { %v2156_v25 = vmul.f32 %v2884_v50, %v2116_v22  ;;  %v2117_v29 = vmul.f32 %v2101_v23, %v2005_v63 }
 0x20b   : > { %2171 = vst [vmem:[%s2997_s30 + $0x28] sm:$0xff] %v2163_v18 }
 0x20c   : > { %v2164_v47 = vsub.f32 %v2108_v57, %v2156_v25  ;;  %v2157_v26 = vmul.f32 %v2886_v2, %v2117_v29 }
 0x20e   : > { %2172 = vst [vmem:[%s2997_s30 + $0x30] sm:$0xff] %v2164_v47  ;;  %v2165_v28 = vsub.f32 %v2109_v60, %v2157_v26 }
 0x210   : > { %2173 = vst [vmem:[%s2997_s30 + $0x38] sm:$0xff] %v2165_v28 }
 0x211 PF: > { %s15_s22 = sadd.s32 1, %s2925_s22   ;;  %s3766_s18 = smov %s2917_s20 }
 0x212   : > { %p12_p9 = scmp.ge.s32.totalorder %s15_s22, 6   ;;  %s3767_s19 = smov %s2921_s21 }
 0x213   : > { %s3768_s20 = smov %s3771_s23  ;;  %s3769_s21 = smov %s3775_s24 }
 0x214   :  { %14 = sbr.rel (!%p12_p9) target bundleno = 3 (0x3), region = 86 }

</bundles_post_ra>
